<compile_context>
chip_gen: v7x
topology: tpu7x:2x2x1
jax: 0.10.0
libtpu: 0.0.40
codegen_flags: <defaults>
</compile_context>

<pallas_src>
import functools

import jax
import jax.numpy as jnp
from jax.experimental import pallas as pl
from jax.experimental.pallas import tpu as pltpu

NEG_SLOPE = 0.01  # nn.LeakyReLU default


def _round_up(x, m):
    return ((x + m - 1) // m) * m


# ----------------------------------------------------------------------------
# Pallas kernel: fused (shift -> matmul -> accumulate) conv + bias + LeakyReLU
# ----------------------------------------------------------------------------
def _fused_conv_kernel(x_ref, w_ref, b_ref, o_ref, acc_ref, *,
                       KH, KW, stride, TH, Wo):
    # x_ref:   (1, Hp_need, Wp, C_in_pad)   padded NHWC image (VMEM resident)
    # w_ref:   (KH*KW, C_in_pad, C_out_pad) per-tap weights, lane-dense C_out
    # b_ref:   (1, C_out_pad)
    # o_ref:   (1, TH*Wo, C_out_pad)        lane-dense output row tile
    # acc_ref: (TH*Wo, C_out_pad) f32 VMEM accumulator
    jt = pl.program_id(1)
    row0 = jt * (TH * stride)          # first padded-input row used by this tile
    TMW = TH * Wo

    acc_ref[...] = jnp.zeros_like(acc_ref)
    for kh in range(KH):
        for kw in range(KW):
            if stride == 1:
                xt = x_ref[0, pl.ds(row0 + kh, TH), pl.ds(kw, Wo), :]
            else:
                xt = x_ref[0, pl.ds(row0 + kh, TH, stride),
                           pl.ds(kw, Wo, stride), :]
            xt = xt.reshape(TMW, xt.shape[-1])           # (TH*Wo, C_in_pad)
            acc_ref[...] += jnp.dot(xt, w_ref[kh * KW + kw],
                                    preferred_element_type=jnp.float32)

    out = acc_ref[...] + b_ref[...]
    out = jnp.where(out >= 0.0, out, NEG_SLOPE * out)    # LeakyReLU
    o_ref[...] = out[None].astype(o_ref.dtype)


# ----------------------------------------------------------------------------
# ReluConv2d forward
# ----------------------------------------------------------------------------
def relu_conv2d_forward(x, weight, bias, *, stride, padding):
    """x: [N, C_in, H, W] (NCHW), weight: [C_out, C_in, KH, KW], bias: [C_out]."""
    N, C_in, H, W = x.shape
    C_out, C_in_w, KH, KW = weight.shape
    assert C_in == C_in_w

    # ReflectionPad2d (halo only — tiny; plain-JAX glue).
    if padding > 0:
        xp = jnp.pad(
            x, ((0, 0), (0, 0), (padding, padding), (padding, padding)),
            mode="reflect",
        )
    else:
        xp = x
    Hp, Wp = xp.shape[2], xp.shape[3]
    Ho = (Hp - KH) // stride + 1
    Wo = (Wp - KW) // stride + 1

    # Lane / sublane friendly padded channel counts.
    C_IN_PAD = _round_up(C_in, 8)
    C_OUT_PAD = _round_up(C_out, 128)

    # Row-tile size: ~512 output positions per grid step.
    TH = max(1, min(Ho, max(1, 512 // max(Wo, 1))))
    n_h_tiles = pl.cdiv(Ho, TH)
    Ho_pad = n_h_tiles * TH
    Hp_need = (Ho_pad - 1) * stride + KH   # input rows needed incl. remainder tiles

    # NCHW -> NHWC (1x input bytes), pad channels to C_IN_PAD and rows to Hp_need.
    x_nhwc = jnp.transpose(xp, (0, 2, 3, 1))
    x_nhwc = jnp.pad(
        x_nhwc,
        ((0, 0), (0, Hp_need - Hp), (0, 0), (0, C_IN_PAD - C_in)),
    )

    # Weights as per-tap [KH*KW, C_in_pad, C_out_pad]; bias as (1, C_out_pad).
    w_taps = jnp.transpose(weight, (2, 3, 1, 0)).reshape(KH * KW, C_in, C_out)
    w_taps = jnp.pad(
        w_taps, ((0, 0), (0, C_IN_PAD - C_in), (0, C_OUT_PAD - C_out))
    )
    b_pad = jnp.pad(bias, (0, C_OUT_PAD - C_out)).reshape(1, C_OUT_PAD)

    kernel = functools.partial(
        _fused_conv_kernel, KH=KH, KW=KW, stride=stride, TH=TH, Wo=Wo
    )

    out3 = pl.pallas_call(
        kernel,
        out_shape=jax.ShapeDtypeStruct((N, Ho_pad * Wo, C_OUT_PAD), x.dtype),
        grid_spec=pltpu.PrefetchScalarGridSpec(
            num_scalar_prefetch=0,
            grid=(N, n_h_tiles),
            in_specs=[
                # Whole padded image for batch n (resident across the row-tile axis).
                pl.BlockSpec((1, Hp_need, Wp, C_IN_PAD),
                             lambda n, j: (n, 0, 0, 0)),
                # Full per-tap weight stack.
                pl.BlockSpec((KH * KW, C_IN_PAD, C_OUT_PAD),
                             lambda n, j: (0, 0, 0)),
                # Bias.
                pl.BlockSpec((1, C_OUT_PAD), lambda n, j: (0, 0)),
            ],
            out_specs=pl.BlockSpec((1, TH * Wo, C_OUT_PAD),
                                   lambda n, j: (n, j, 0)),
            scratch_shapes=[pltpu.VMEM((TH * Wo, C_OUT_PAD), jnp.float32)],
        ),
        compiler_params=pltpu.CompilerParams(
            dimension_semantics=("parallel", "parallel"),
        ),
    )(x_nhwc, w_taps, b_pad)

    # Drop channel / row padding; convert to NCHW only at the module boundary.
    out = out3.reshape(N, Ho_pad, Wo, C_OUT_PAD)[:, :Ho, :, :C_out]
    out = jnp.transpose(out, (0, 3, 1, 2))
    return out


# ----------------------------------------------------------------------------
# Pure-JAX reference for sanity check
# ----------------------------------------------------------------------------
def _reference(x, weight, bias, *, stride, padding):
    if padding > 0:
        xp = jnp.pad(
            x, ((0, 0), (0, 0), (padding, padding), (padding, padding)),
            mode="reflect",
        )
    else:
        xp = x
    y = jax.lax.conv_general_dilated(
        xp, weight, window_strides=(stride, stride), padding="VALID",
        dimension_numbers=("NCHW", "OIHW", "NCHW"),
    )
    y = y + bias.reshape(1, -1, 1, 1)
    return jnp.where(y >= 0.0, y, NEG_SLOPE * y)


if __name__ == "__main__":
    # Module config: ReluConv2d(n_in=4, n_out=8, kernel_size=3, stride=1, padding=1)
    n_in, n_out, ksize, stride, padding = 4, 8, 3, 1, 1
    N, H, W = 2, 16, 16

    key = jax.random.PRNGKey(0)
    kx, kw, kb = jax.random.split(key, 3)
    x = jax.random.normal(kx, (N, n_in, H, W), dtype=jnp.float32)

    # Deterministic parameter init (kaiming-uniform-like bound, synthetic).
    fan_in = n_in * ksize * ksize
    bound = 1.0 / (fan_in ** 0.5)
    weight = jax.random.uniform(
        kw, (n_out, n_in, ksize, ksize), minval=-bound, maxval=bound,
        dtype=jnp.float32,
    )
    bias = jax.random.uniform(
        kb, (n_out,), minval=-bound, maxval=bound, dtype=jnp.float32
    )

    fwd = jax.jit(
        functools.partial(relu_conv2d_forward, stride=stride, padding=padding)
    )
    out = fwd(x, weight, bias)
    out = jax.block_until_ready(out)

    ref = _reference(x, weight, bias, stride=stride, padding=padding)
    assert out.shape == (N, n_out, H, W), out.shape
    assert jnp.allclose(out, ref, atol=1e-4, rtol=1e-4), (
        float(jnp.max(jnp.abs(out - ref)))
    )

    print("KERNEL_OK")
</pallas_src>

<mosaic_0001>
module attributes {stable_mosaic.version = 11 : i64} {
  func.func @_fused_conv_kernel(%arg0: i32, %arg1: i32, %arg2: memref<1x18x18x8xf32, #tpu.memory_space<vmem>>, %arg3: memref<9x8x128xf32, #tpu.memory_space<vmem>>, %arg4: memref<1x128xf32, #tpu.memory_space<vmem>>, %arg5: memref<1x256x128xf32, #tpu.memory_space<vmem>>, %arg6: memref<256x128xf32, #tpu.memory_space<vmem>>) attributes {dimension_semantics = [#tpu.dimension_semantics<parallel>, #tpu.dimension_semantics<parallel>], iteration_bounds = array<i64: 2, 1>, scalar_prefetch = 0 : i64, scratch_operands = 1 : i64, tpu.core_type = #tpu.core_type<tc>, window_params = [{transform_indices = @transform_0, window_bounds = array<i64: 1, 18, 18, 8>}, {pipeline_mode = #tpu.pipeline_mode<synchronous>, transform_indices = @transform_1, window_bounds = array<i64: 9, 8, 128>}, {pipeline_mode = #tpu.pipeline_mode<synchronous>, transform_indices = @transform_2, window_bounds = array<i64: 1, 128>}, {transform_indices = @transform_3, window_bounds = array<i64: 1, 256, 128>}]} {
    %c16_i32 = arith.constant 16 : i32
    %0 = arith.muli %arg1, %c16_i32 : i32
    %cst = arith.constant 0.000000e+00 : f32
    %1 = vector.broadcast %cst : f32 to vector<256x128xf32>
    %c0 = arith.constant 0 : index
    %c0_0 = arith.constant 0 : index
    %2 = vector.load %arg6[%c0, %c0_0] : memref<256x128xf32, #tpu.memory_space<vmem>>, vector<256x128xf32>
    tpu.vector_store %arg6[%c0, %c0_0], %1 {strides = array<i32>} : memref<256x128xf32, #tpu.memory_space<vmem>>, vector<256x128xf32>,
    %c0_i32 = arith.constant 0 : i32
    %3 = arith.addi %0, %c0_i32 : i32
    %c0_1 = arith.constant 0 : index
    %4 = arith.index_cast %3 : i32 to index
    %c0_2 = arith.constant 0 : index
    %c0_3 = arith.constant 0 : index
    %5 = vector.load %arg2[%c0_1, %4, %c0_2, %c0_3] : memref<1x18x18x8xf32, #tpu.memory_space<vmem>>, vector<1x16x16x8xf32>
    %6 = vector.shape_cast %5 : vector<1x16x16x8xf32> to vector<16x16x8xf32>
    %7 = vector.shape_cast %6 : vector<16x16x8xf32> to vector<256x8xf32>
    %c0_4 = arith.constant 0 : index
    %c0_5 = arith.constant 0 : index
    %8 = vector.load %arg6[%c0_4, %c0_5] : memref<256x128xf32, #tpu.memory_space<vmem>>, vector<256x128xf32>
    %c0_6 = arith.constant 0 : index
    %c0_7 = arith.constant 0 : index
    %c0_8 = arith.constant 0 : index
    %9 = vector.load %arg3[%c0_6, %c0_7, %c0_8] : memref<9x8x128xf32, #tpu.memory_space<vmem>>, vector<1x8x128xf32>
    %10 = vector.shape_cast %9 : vector<1x8x128xf32> to vector<8x128xf32>
    %cst_9 = arith.constant dense<0.000000e+00> : vector<256x128xf32>
    %11 = tpu.matmul %7, %10, %cst_9 {dimension_numbers = #tpu.dot_dimension_numbers<[1], [0], [0], [1], [0, 0, 1, 1], [], []>} : vector<256x8xf32>, vector<8x128xf32>, vector<256x128xf32> -> vector<256x128xf32>
    %12 = arith.addf %8, %11 : vector<256x128xf32>
    %c0_10 = arith.constant 0 : index
    %c0_11 = arith.constant 0 : index
    %13 = vector.load %arg6[%c0_10, %c0_11] : memref<256x128xf32, #tpu.memory_space<vmem>>, vector<256x128xf32>
    tpu.vector_store %arg6[%c0_10, %c0_11], %12 {strides = array<i32>} : memref<256x128xf32, #tpu.memory_space<vmem>>, vector<256x128xf32>,
    %c0_i32_12 = arith.constant 0 : i32
    %14 = arith.addi %0, %c0_i32_12 : i32
    %c0_13 = arith.constant 0 : index
    %15 = arith.index_cast %14 : i32 to index
    %c1 = arith.constant 1 : index
    %c0_14 = arith.constant 0 : index
    %16 = vector.load %arg2[%c0_13, %15, %c1, %c0_14] : memref<1x18x18x8xf32, #tpu.memory_space<vmem>>, vector<1x16x16x8xf32>
    %17 = vector.shape_cast %16 : vector<1x16x16x8xf32> to vector<16x16x8xf32>
    %18 = vector.shape_cast %17 : vector<16x16x8xf32> to vector<256x8xf32>
    %c0_15 = arith.constant 0 : index
    %c0_16 = arith.constant 0 : index
    %19 = vector.load %arg6[%c0_15, %c0_16] : memref<256x128xf32, #tpu.memory_space<vmem>>, vector<256x128xf32>
    %c1_17 = arith.constant 1 : index
    %c0_18 = arith.constant 0 : index
    %c0_19 = arith.constant 0 : index
    %20 = vector.load %arg3[%c1_17, %c0_18, %c0_19] : memref<9x8x128xf32, #tpu.memory_space<vmem>>, vector<1x8x128xf32>
    %21 = vector.shape_cast %20 : vector<1x8x128xf32> to vector<8x128xf32>
    %cst_20 = arith.constant dense<0.000000e+00> : vector<256x128xf32>
    %22 = tpu.matmul %18, %21, %cst_20 {dimension_numbers = #tpu.dot_dimension_numbers<[1], [0], [0], [1], [0, 0, 1, 1], [], []>} : vector<256x8xf32>, vector<8x128xf32>, vector<256x128xf32> -> vector<256x128xf32>
    %23 = arith.addf %19, %22 : vector<256x128xf32>
    %c0_21 = arith.constant 0 : index
    %c0_22 = arith.constant 0 : index
    %24 = vector.load %arg6[%c0_21, %c0_22] : memref<256x128xf32, #tpu.memory_space<vmem>>, vector<256x128xf32>
    tpu.vector_store %arg6[%c0_21, %c0_22], %23 {strides = array<i32>} : memref<256x128xf32, #tpu.memory_space<vmem>>, vector<256x128xf32>,
    %c0_i32_23 = arith.constant 0 : i32
    %25 = arith.addi %0, %c0_i32_23 : i32
    %c0_24 = arith.constant 0 : index
    %26 = arith.index_cast %25 : i32 to index
    %c2 = arith.constant 2 : index
    %c0_25 = arith.constant 0 : index
    %27 = vector.load %arg2[%c0_24, %26, %c2, %c0_25] : memref<1x18x18x8xf32, #tpu.memory_space<vmem>>, vector<1x16x16x8xf32>
    %28 = vector.shape_cast %27 : vector<1x16x16x8xf32> to vector<16x16x8xf32>
    %29 = vector.shape_cast %28 : vector<16x16x8xf32> to vector<256x8xf32>
    %c0_26 = arith.constant 0 : index
    %c0_27 = arith.constant 0 : index
    %30 = vector.load %arg6[%c0_26, %c0_27] : memref<256x128xf32, #tpu.memory_space<vmem>>, vector<256x128xf32>
    %c2_28 = arith.constant 2 : index
    %c0_29 = arith.constant 0 : index
    %c0_30 = arith.constant 0 : index
    %31 = vector.load %arg3[%c2_28, %c0_29, %c0_30] : memref<9x8x128xf32, #tpu.memory_space<vmem>>, vector<1x8x128xf32>
    %32 = vector.shape_cast %31 : vector<1x8x128xf32> to vector<8x128xf32>
    %cst_31 = arith.constant dense<0.000000e+00> : vector<256x128xf32>
    %33 = tpu.matmul %29, %32, %cst_31 {dimension_numbers = #tpu.dot_dimension_numbers<[1], [0], [0], [1], [0, 0, 1, 1], [], []>} : vector<256x8xf32>, vector<8x128xf32>, vector<256x128xf32> -> vector<256x128xf32>
    %34 = arith.addf %30, %33 : vector<256x128xf32>
    %c0_32 = arith.constant 0 : index
    %c0_33 = arith.constant 0 : index
    %35 = vector.load %arg6[%c0_32, %c0_33] : memref<256x128xf32, #tpu.memory_space<vmem>>, vector<256x128xf32>
    tpu.vector_store %arg6[%c0_32, %c0_33], %34 {strides = array<i32>} : memref<256x128xf32, #tpu.memory_space<vmem>>, vector<256x128xf32>,
    %c1_i32 = arith.constant 1 : i32
    %36 = arith.addi %0, %c1_i32 : i32
    %c0_34 = arith.constant 0 : index
    %37 = arith.index_cast %36 : i32 to index
    %c0_35 = arith.constant 0 : index
    %c0_36 = arith.constant 0 : index
    %38 = vector.load %arg2[%c0_34, %37, %c0_35, %c0_36] : memref<1x18x18x8xf32, #tpu.memory_space<vmem>>, vector<1x16x16x8xf32>
    %39 = vector.shape_cast %38 : vector<1x16x16x8xf32> to vector<16x16x8xf32>
    %40 = vector.shape_cast %39 : vector<16x16x8xf32> to vector<256x8xf32>
    %c0_37 = arith.constant 0 : index
    %c0_38 = arith.constant 0 : index
    %41 = vector.load %arg6[%c0_37, %c0_38] : memref<256x128xf32, #tpu.memory_space<vmem>>, vector<256x128xf32>
    %c3 = arith.constant 3 : index
    %c0_39 = arith.constant 0 : index
    %c0_40 = arith.constant 0 : index
    %42 = vector.load %arg3[%c3, %c0_39, %c0_40] : memref<9x8x128xf32, #tpu.memory_space<vmem>>, vector<1x8x128xf32>
    %43 = vector.shape_cast %42 : vector<1x8x128xf32> to vector<8x128xf32>
    %cst_41 = arith.constant dense<0.000000e+00> : vector<256x128xf32>
    %44 = tpu.matmul %40, %43, %cst_41 {dimension_numbers = #tpu.dot_dimension_numbers<[1], [0], [0], [1], [0, 0, 1, 1], [], []>} : vector<256x8xf32>, vector<8x128xf32>, vector<256x128xf32> -> vector<256x128xf32>
    %45 = arith.addf %41, %44 : vector<256x128xf32>
    %c0_42 = arith.constant 0 : index
    %c0_43 = arith.constant 0 : index
    %46 = vector.load %arg6[%c0_42, %c0_43] : memref<256x128xf32, #tpu.memory_space<vmem>>, vector<256x128xf32>
    tpu.vector_store %arg6[%c0_42, %c0_43], %45 {strides = array<i32>} : memref<256x128xf32, #tpu.memory_space<vmem>>, vector<256x128xf32>,
    %c1_i32_44 = arith.constant 1 : i32
    %47 = arith.addi %0, %c1_i32_44 : i32
    %c0_45 = arith.constant 0 : index
    %48 = arith.index_cast %47 : i32 to index
    %c1_46 = arith.constant 1 : index
    %c0_47 = arith.constant 0 : index
    %49 = vector.load %arg2[%c0_45, %48, %c1_46, %c0_47] : memref<1x18x18x8xf32, #tpu.memory_space<vmem>>, vector<1x16x16x8xf32>
    %50 = vector.shape_cast %49 : vector<1x16x16x8xf32> to vector<16x16x8xf32>
    %51 = vector.shape_cast %50 : vector<16x16x8xf32> to vector<256x8xf32>
    %c0_48 = arith.constant 0 : index
    %c0_49 = arith.constant 0 : index
    %52 = vector.load %arg6[%c0_48, %c0_49] : memref<256x128xf32, #tpu.memory_space<vmem>>, vector<256x128xf32>
    %c4 = arith.constant 4 : index
    %c0_50 = arith.constant 0 : index
    %c0_51 = arith.constant 0 : index
    %53 = vector.load %arg3[%c4, %c0_50, %c0_51] : memref<9x8x128xf32, #tpu.memory_space<vmem>>, vector<1x8x128xf32>
    %54 = vector.shape_cast %53 : vector<1x8x128xf32> to vector<8x128xf32>
    %cst_52 = arith.constant dense<0.000000e+00> : vector<256x128xf32>
    %55 = tpu.matmul %51, %54, %cst_52 {dimension_numbers = #tpu.dot_dimension_numbers<[1], [0], [0], [1], [0, 0, 1, 1], [], []>} : vector<256x8xf32>, vector<8x128xf32>, vector<256x128xf32> -> vector<256x128xf32>
    %56 = arith.addf %52, %55 : vector<256x128xf32>
    %c0_53 = arith.constant 0 : index
    %c0_54 = arith.constant 0 : index
    %57 = vector.load %arg6[%c0_53, %c0_54] : memref<256x128xf32, #tpu.memory_space<vmem>>, vector<256x128xf32>
    tpu.vector_store %arg6[%c0_53, %c0_54], %56 {strides = array<i32>} : memref<256x128xf32, #tpu.memory_space<vmem>>, vector<256x128xf32>,
    %c1_i32_55 = arith.constant 1 : i32
    %58 = arith.addi %0, %c1_i32_55 : i32
    %c0_56 = arith.constant 0 : index
    %59 = arith.index_cast %58 : i32 to index
    %c2_57 = arith.constant 2 : index
    %c0_58 = arith.constant 0 : index
    %60 = vector.load %arg2[%c0_56, %59, %c2_57, %c0_58] : memref<1x18x18x8xf32, #tpu.memory_space<vmem>>, vector<1x16x16x8xf32>
    %61 = vector.shape_cast %60 : vector<1x16x16x8xf32> to vector<16x16x8xf32>
    %62 = vector.shape_cast %61 : vector<16x16x8xf32> to vector<256x8xf32>
    %c0_59 = arith.constant 0 : index
    %c0_60 = arith.constant 0 : index
    %63 = vector.load %arg6[%c0_59, %c0_60] : memref<256x128xf32, #tpu.memory_space<vmem>>, vector<256x128xf32>
    %c5 = arith.constant 5 : index
    %c0_61 = arith.constant 0 : index
    %c0_62 = arith.constant 0 : index
    %64 = vector.load %arg3[%c5, %c0_61, %c0_62] : memref<9x8x128xf32, #tpu.memory_space<vmem>>, vector<1x8x128xf32>
    %65 = vector.shape_cast %64 : vector<1x8x128xf32> to vector<8x128xf32>
    %cst_63 = arith.constant dense<0.000000e+00> : vector<256x128xf32>
    %66 = tpu.matmul %62, %65, %cst_63 {dimension_numbers = #tpu.dot_dimension_numbers<[1], [0], [0], [1], [0, 0, 1, 1], [], []>} : vector<256x8xf32>, vector<8x128xf32>, vector<256x128xf32> -> vector<256x128xf32>
    %67 = arith.addf %63, %66 : vector<256x128xf32>
    %c0_64 = arith.constant 0 : index
    %c0_65 = arith.constant 0 : index
    %68 = vector.load %arg6[%c0_64, %c0_65] : memref<256x128xf32, #tpu.memory_space<vmem>>, vector<256x128xf32>
    tpu.vector_store %arg6[%c0_64, %c0_65], %67 {strides = array<i32>} : memref<256x128xf32, #tpu.memory_space<vmem>>, vector<256x128xf32>,
    %c2_i32 = arith.constant 2 : i32
    %69 = arith.addi %0, %c2_i32 : i32
    %c0_66 = arith.constant 0 : index
    %70 = arith.index_cast %69 : i32 to index
    %c0_67 = arith.constant 0 : index
    %c0_68 = arith.constant 0 : index
    %71 = vector.load %arg2[%c0_66, %70, %c0_67, %c0_68] : memref<1x18x18x8xf32, #tpu.memory_space<vmem>>, vector<1x16x16x8xf32>
    %72 = vector.shape_cast %71 : vector<1x16x16x8xf32> to vector<16x16x8xf32>
    %73 = vector.shape_cast %72 : vector<16x16x8xf32> to vector<256x8xf32>
    %c0_69 = arith.constant 0 : index
    %c0_70 = arith.constant 0 : index
    %74 = vector.load %arg6[%c0_69, %c0_70] : memref<256x128xf32, #tpu.memory_space<vmem>>, vector<256x128xf32>
    %c6 = arith.constant 6 : index
    %c0_71 = arith.constant 0 : index
    %c0_72 = arith.constant 0 : index
    %75 = vector.load %arg3[%c6, %c0_71, %c0_72] : memref<9x8x128xf32, #tpu.memory_space<vmem>>, vector<1x8x128xf32>
    %76 = vector.shape_cast %75 : vector<1x8x128xf32> to vector<8x128xf32>
    %cst_73 = arith.constant dense<0.000000e+00> : vector<256x128xf32>
    %77 = tpu.matmul %73, %76, %cst_73 {dimension_numbers = #tpu.dot_dimension_numbers<[1], [0], [0], [1], [0, 0, 1, 1], [], []>} : vector<256x8xf32>, vector<8x128xf32>, vector<256x128xf32> -> vector<256x128xf32>
    %78 = arith.addf %74, %77 : vector<256x128xf32>
    %c0_74 = arith.constant 0 : index
    %c0_75 = arith.constant 0 : index
    %79 = vector.load %arg6[%c0_74, %c0_75] : memref<256x128xf32, #tpu.memory_space<vmem>>, vector<256x128xf32>
    tpu.vector_store %arg6[%c0_74, %c0_75], %78 {strides = array<i32>} : memref<256x128xf32, #tpu.memory_space<vmem>>, vector<256x128xf32>,
    %c2_i32_76 = arith.constant 2 : i32
    %80 = arith.addi %0, %c2_i32_76 : i32
    %c0_77 = arith.constant 0 : index
    %81 = arith.index_cast %80 : i32 to index
    %c1_78 = arith.constant 1 : index
    %c0_79 = arith.constant 0 : index
    %82 = vector.load %arg2[%c0_77, %81, %c1_78, %c0_79] : memref<1x18x18x8xf32, #tpu.memory_space<vmem>>, vector<1x16x16x8xf32>
    %83 = vector.shape_cast %82 : vector<1x16x16x8xf32> to vector<16x16x8xf32>
    %84 = vector.shape_cast %83 : vector<16x16x8xf32> to vector<256x8xf32>
    %c0_80 = arith.constant 0 : index
    %c0_81 = arith.constant 0 : index
    %85 = vector.load %arg6[%c0_80, %c0_81] : memref<256x128xf32, #tpu.memory_space<vmem>>, vector<256x128xf32>
    %c7 = arith.constant 7 : index
    %c0_82 = arith.constant 0 : index
    %c0_83 = arith.constant 0 : index
    %86 = vector.load %arg3[%c7, %c0_82, %c0_83] : memref<9x8x128xf32, #tpu.memory_space<vmem>>, vector<1x8x128xf32>
    %87 = vector.shape_cast %86 : vector<1x8x128xf32> to vector<8x128xf32>
    %cst_84 = arith.constant dense<0.000000e+00> : vector<256x128xf32>
    %88 = tpu.matmul %84, %87, %cst_84 {dimension_numbers = #tpu.dot_dimension_numbers<[1], [0], [0], [1], [0, 0, 1, 1], [], []>} : vector<256x8xf32>, vector<8x128xf32>, vector<256x128xf32> -> vector<256x128xf32>
    %89 = arith.addf %85, %88 : vector<256x128xf32>
    %c0_85 = arith.constant 0 : index
    %c0_86 = arith.constant 0 : index
    %90 = vector.load %arg6[%c0_85, %c0_86] : memref<256x128xf32, #tpu.memory_space<vmem>>, vector<256x128xf32>
    tpu.vector_store %arg6[%c0_85, %c0_86], %89 {strides = array<i32>} : memref<256x128xf32, #tpu.memory_space<vmem>>, vector<256x128xf32>,
    %c2_i32_87 = arith.constant 2 : i32
    %91 = arith.addi %0, %c2_i32_87 : i32
    %c0_88 = arith.constant 0 : index
    %92 = arith.index_cast %91 : i32 to index
    %c2_89 = arith.constant 2 : index
    %c0_90 = arith.constant 0 : index
    %93 = vector.load %arg2[%c0_88, %92, %c2_89, %c0_90] : memref<1x18x18x8xf32, #tpu.memory_space<vmem>>, vector<1x16x16x8xf32>
    %94 = vector.shape_cast %93 : vector<1x16x16x8xf32> to vector<16x16x8xf32>
    %95 = vector.shape_cast %94 : vector<16x16x8xf32> to vector<256x8xf32>
    %c0_91 = arith.constant 0 : index
    %c0_92 = arith.constant 0 : index
    %96 = vector.load %arg6[%c0_91, %c0_92] : memref<256x128xf32, #tpu.memory_space<vmem>>, vector<256x128xf32>
    %c8 = arith.constant 8 : index
    %c0_93 = arith.constant 0 : index
    %c0_94 = arith.constant 0 : index
    %97 = vector.load %arg3[%c8, %c0_93, %c0_94] : memref<9x8x128xf32, #tpu.memory_space<vmem>>, vector<1x8x128xf32>
    %98 = vector.shape_cast %97 : vector<1x8x128xf32> to vector<8x128xf32>
    %cst_95 = arith.constant dense<0.000000e+00> : vector<256x128xf32>
    %99 = tpu.matmul %95, %98, %cst_95 {dimension_numbers = #tpu.dot_dimension_numbers<[1], [0], [0], [1], [0, 0, 1, 1], [], []>} : vector<256x8xf32>, vector<8x128xf32>, vector<256x128xf32> -> vector<256x128xf32>
    %100 = arith.addf %96, %99 : vector<256x128xf32>
    %c0_96 = arith.constant 0 : index
    %c0_97 = arith.constant 0 : index
    %101 = vector.load %arg6[%c0_96, %c0_97] : memref<256x128xf32, #tpu.memory_space<vmem>>, vector<256x128xf32>
    tpu.vector_store %arg6[%c0_96, %c0_97], %100 {strides = array<i32>} : memref<256x128xf32, #tpu.memory_space<vmem>>, vector<256x128xf32>,
    %c0_98 = arith.constant 0 : index
    %c0_99 = arith.constant 0 : index
    %102 = vector.load %arg6[%c0_98, %c0_99] : memref<256x128xf32, #tpu.memory_space<vmem>>, vector<256x128xf32>
    %c0_100 = arith.constant 0 : index
    %c0_101 = arith.constant 0 : index
    %103 = vector.load %arg4[%c0_100, %c0_101] : memref<1x128xf32, #tpu.memory_space<vmem>>, vector<1x128xf32>
    %104 = vector.broadcast %103 : vector<1x128xf32> to vector<256x128xf32>
    %105 = arith.addf %102, %104 : vector<256x128xf32>
    %cst_102 = arith.constant 0.000000e+00 : f32
    %106 = vector.broadcast %cst_102 : f32 to vector<256x128xf32>
    %107 = arith.cmpf oge, %105, %106 : vector<256x128xf32>
    %cst_103 = arith.constant 0.00999999977 : f32
    %108 = vector.broadcast %cst_103 : f32 to vector<256x128xf32>
    %109 = arith.mulf %108, %105 : vector<256x128xf32>
    %110 = arith.select %107, %105, %109 : vector<256x128xi1>, vector<256x128xf32>
    %111 = vector.shape_cast %110 : vector<256x128xf32> to vector<1x256x128xf32>
    %c0_104 = arith.constant 0 : index
    %c0_105 = arith.constant 0 : index
    %c0_106 = arith.constant 0 : index
    %112 = vector.load %arg5[%c0_104, %c0_105, %c0_106] : memref<1x256x128xf32, #tpu.memory_space<vmem>>, vector<1x256x128xf32>
    tpu.vector_store %arg5[%c0_104, %c0_105, %c0_106], %111 {strides = array<i32>} : memref<1x256x128xf32, #tpu.memory_space<vmem>>, vector<1x256x128xf32>,
    return
  }
  func.func @transform_0(%arg0: i32, %arg1: i32) -> (i32, i32, i32, i32) {
    %c0_i32 = arith.constant 0 : i32
    %c0_i32_0 = arith.constant 0 : i32
    %c0_i32_1 = arith.constant 0 : i32
    %c0_i32_2 = arith.constant 0 : i32
    return %arg0, %c0_i32, %c0_i32_0, %c0_i32_1 : i32, i32, i32, i32
  }
  func.func @transform_1(%arg0: i32, %arg1: i32) -> (i32, i32, i32) {
    %c0_i32 = arith.constant 0 : i32
    %c0_i32_0 = arith.constant 0 : i32
    %c0_i32_1 = arith.constant 0 : i32
    %c0_i32_2 = arith.constant 0 : i32
    return %c0_i32, %c0_i32_0, %c0_i32_1 : i32, i32, i32
  }
  func.func @transform_2(%arg0: i32, %arg1: i32) -> (i32, i32) {
    %c0_i32 = arith.constant 0 : i32
    %c0_i32_0 = arith.constant 0 : i32
    %c0_i32_1 = arith.constant 0 : i32
    return %c0_i32, %c0_i32_0 : i32, i32
  }
  func.func @transform_3(%arg0: i32, %arg1: i32) -> (i32, i32, i32) {
    %c0_i32 = arith.constant 0 : i32
    %c0_i32_0 = arith.constant 0 : i32
    return %arg0, %arg1, %c0_i32 : i32, i32, i32
  }
}

</mosaic_0001>

<bundles_post_ra>
// kernel: relu_conv2d_forward.1
= control target key start
LH: loop header
LB: loop body
LE: loop exit
PB: predicated region body
PF: predicated region fallthrough
CT: control target
= control target key end

     0   :  { %s6158_s12 = smov 0   ;;  %s6160_s13 = smov 0   ;;  %s7206_s0 = inlined_call_operand.vmem [shape: f32[2,18,18,8], index: 0, kind: input, shape index: {}]   ;;  %s7207_s1 = inlined_call_operand.vmem [shape: f32[9,8,128], index: 1, kind: input, shape index: {}]   ;;  %s7208_s2 = inlined_call_operand.vmem [shape: f32[1,128], index: 2, kind: input, shape index: {}]   ;;  %s7209_s3 = inlined_call_operand.vmem [shape: f32[2,256,128], index: 3, kind: output, shape index: {}]  }
   0x1   :  { %s6162_s14 = smov 0  }
   0x2 LB: > { %s25_s15 = sadd.s32 1, %s6132_s13  ;;  %p4588_p0 = scmp.ge.s32.totalorder %s6136_s14, 1  ;;  %s6136_s14 = sphi %s6162_s14, %s13_s14   ;;  %s6132_s13 = sphi %s6160_s13, %s7331_s13   ;;  %s6128_s12 = sphi %s6158_s12, %s7330_s12  }
   0x3   : > { %p27_p1 = scmp.ge.s32.totalorder %s25_s15, 2  ;;  %p151_p2 = scmp.lt.s32.totalorder %s6136_s14, 3 }
   0x5   : > { %s7333_s15 = smov (%p27_p1, %s25_s15), 0  ;;  %p152_p3 = pnand %p4588_p0, %p151_p2 }
   0x7   : > { %155 = sbr.rel (%p152_p3) target bundleno = 528 (0x210), region = 32 }
   0xe   : > { %v293_v0 = vld [vmem:[%s7207_s1] sm:$0xff]  ;;  %p179_p4 = scmp.lt.s32.totalorder %s6128_s12, 1  ;;  %v4624_v2 = vld [vmem:[%s7207_s1 + $0x8] sm:$0xff]  ;;  %vm294_vm0 = vcmask 64512   ;;  %v6223_v10 = vld [vmem:[%s7207_s1 + $0x30] sm:$0xff] }
   0xf   : > { %v6182_v1 = vld [vmem:[%s7207_s1 + $0x20] sm:$0xff]  ;;  %5381 = vmatprep.subr.mxu1 %v293_v0  ;;  %v4852_v3 = vld [vmem:[%s7207_s1 + $0x28] sm:$0xff]  ;;  %v6228_v11 = vld [vmem:[%s7207_s1 + $0x10] sm:$0xff] }
  0x10   : > { %5581 = vmatprep.subr.mxu0 %v6182_v1  ;;  %5382 = vmatpush3.msra.mxu1 %v293_v0  ;;  %s7335_s12 = smov (!%p179_p4, %s6128_s12), 1  ;;  %v6391_v44 = vld [vmem:[%s7207_s1 + $0x38] sm:$0xff] }
  0x11   : > { %5582 = vmatpush3.msra.mxu0 %v6182_v1  ;;  %5431 = vmatprep.subr.mxu1 %v4624_v2  ;;  %s6089_s24 = smul.u32 432, %s7335_s12  ;;  %s5083_s17 = sshll.u32 %s7335_s12, 8 }
  0x12   : > { %5631 = vmatprep.subr.mxu0 %v4852_v3  ;;  %s7126_s20 = scalar_lea.vmem %s7209_s3, %s5083_s17 }
  0x13   : > { %s6198_s27 = scalar_lea.vmem %s7206_s0, %s6089_s24 }
  0x14   : > { %v229_v4 = vld [vmem:[%s6198_s27] sm:$0xff]  ;;  %v230_v6 = vld [vmem:[%s6198_s27 + $0x8] sm:$0xff]  ;;  %v6212_v8 = vld [vmem:[%s6198_s27 + $0x18] sm:$0xff] }
  0x15   : > { %v6202_v5 = vld [vmem:[%s6198_s27 + $0x19] sm:$0xff]  ;;  %5383 = vmatprep.mubr.msk.f32.mxu1 %vm294_vm0, %v229_v4  ;;  %v6209_v7 = vld [vmem:[%s6198_s27 + $0x21] sm:$0xff]  ;;  %7260 = vst [vmem:[#allocation3_spill] sm:$0xff] %v6212_v8  ;;  %v6215_v9 = vld [vmem:[%s6198_s27 + $0x31] sm:$0xff] }
  0x16   : > { %5583 = vmatprep.mubr.msk.f32.mxu0 %vm294_vm0, %v6202_v5  ;;  %5384 = vmatmul.mubr.msk.f32.vlgmr.msra.gmra.mrb[0].mxu1 %vm294_vm0, %v230_v6  ;;  %v6231_v12 = vld [vmem:[%s6198_s27 + $0x20] sm:$0xff]  ;;  %v6241_v14 = vld [vmem:[%s6198_s27 + $0x30] sm:$0xff]  ;;  %v6257_v16 = vld [vmem:[%s6198_s27 + $0x38] sm:$0xff] }
  0x17   : > { %5584 = vmatmul.mubr.msk.f32.vlgmr.msra.gmra.mrb[0].mxu0 %vm294_vm0, %v6209_v7  ;;  %5432 = vmatpush3.msra.mxu1 %v4624_v2  ;;  %7261 = vst [vmem:[#allocation4_spill] sm:$0xff] %v6231_v12  ;;  %v6234_v13 = vld [vmem:[%s6198_s27 + $0x39] sm:$0xff]  ;;  %7262 = vst [vmem:[#allocation5_spill] sm:$0xff] %v6241_v14  ;;  %v6244_v15 = vld [vmem:[%s6198_s27 + $0x49] sm:$0xff] }
  0x18   : > { %5632 = vmatpush3.msra.mxu0 %v4852_v3  ;;  %5386 = vmatprep.mubr.msk.f32.mxu1 %vm294_vm0, %v6212_v8  ;;  %v6260_v17 = vld [vmem:[%s6198_s27 + $0x51] sm:$0xff]  ;;  %v6263_v18 = vld [vmem:[%s6198_s27 + $0x48] sm:$0xff]  ;;  %v6283_v22 = vld [vmem:[%s6198_s27 + $0x60] sm:$0xff] }
  0x19   : > { %5586 = vmatprep.mubr.msk.f32.mxu0 %vm294_vm0, %v6215_v9  ;;  %5681 = vmatprep.subr.mxu0 %v6223_v10  ;;  %7263 = vst [vmem:[#allocation6_spill] sm:$0xff] %v6263_v18  ;;  %v6266_v19 = vld [vmem:[%s6198_s27 + $0x61] sm:$0xff]  ;;  %v6277_v20 = vld [vmem:[%s6198_s27 + $0x50] sm:$0xff]  ;;  %7265 = vst [vmem:[#allocation8_spill] sm:$0xff] %v6283_v22 }
  0x1a   : > { %5481 = vmatprep.subr.mxu1 %v6228_v11  ;;  %5387 = vmatmul.mubr.msk.f32.gmra.mrb[2].mxu1 %vm294_vm0, %v6231_v12  ;;  %7264 = vst [vmem:[#allocation7_spill] sm:$0xff] %v6277_v20  ;;  %v6280_v21 = vld [vmem:[%s6198_s27 + $0x69] sm:$0xff]  ;;  %v6286_v23 = vld [vmem:[%s6198_s27 + $0x79] sm:$0xff]  ;;  %v6300_v25 = vld [vmem:[%s6198_s27 + $0x81] sm:$0xff] }
  0x1b   : > { %5587 = vmatmul.mubr.msk.f32.gmra.mrb[2].mxu0 %vm294_vm0, %v6234_v13  ;;  %5389 = vmatprep.mubr.msk.f32.mxu1 %vm294_vm0, %v6241_v14  ;;  %v6297_v24 = vld [vmem:[%s6198_s27 + $0x68] sm:$0xff]  ;;  %v6303_v26 = vld [vmem:[%s6198_s27 + $0x78] sm:$0xff]  ;;  %v6317_v28 = vld [vmem:[%s6198_s27 + $0x80] sm:$0xff] }
  0x1c   : > { %5589 = vmatprep.mubr.msk.f32.mxu0 %vm294_vm0, %v6244_v15  ;;  %7266 = vst [vmem:[#allocation9_spill] sm:$0xff] %v6297_v24  ;;  %7267 = vst [vmem:[#allocation10_spill] sm:$0xff] %v6303_v26  ;;  %v6306_v27 = vld [vmem:[%s6198_s27 + $0x91] sm:$0xff]  ;;  %v6320_v29 = vld [vmem:[%s6198_s27 + $0x99] sm:$0xff] }
  0x1d   : > { %7268 = vst [vmem:[#allocation11_spill] sm:$0xff] %v6317_v28  ;;  %v6323_v30 = vld [vmem:[%s6198_s27 + $0x90] sm:$0xff]  ;;  %v6337_v32 = vld [vmem:[%s6198_s27 + $0x98] sm:$0xff]  ;;  %v6343_v34 = vld [vmem:[%s6198_s27 + $0xa8] sm:$0xff] }
  0x1e   : > { %5390 = vmatmul.mubr.msk.f32.gmra.mrb[4].mxu1 %vm294_vm0, %v6257_v16  ;;  %7269 = vst [vmem:[#allocation12_spill] sm:$0xff] %v6323_v30  ;;  %v6326_v31 = vld [vmem:[%s6198_s27 + $0xa9] sm:$0xff]  ;;  %7270 = vst [vmem:[#allocation13_spill] sm:$0xff] %v6337_v32  ;;  %v6340_v33 = vld [vmem:[%s6198_s27 + $0xb1] sm:$0xff] }
  0x1f   : > { %5590 = vmatmul.mubr.msk.f32.gmra.mrb[4].mxu0 %vm294_vm0, %v6260_v17  ;;  %5392 = vmatprep.mubr.msk.f32.mxu1 %vm294_vm0, %v6263_v18  ;;  %7271 = vst [vmem:[#allocation14_spill] sm:$0xff] %v6343_v34  ;;  %v6346_v35 = vld [vmem:[%s6198_s27 + $0xc1] sm:$0xff]  ;;  %v6357_v36 = vld [vmem:[%s6198_s27 + $0xb0] sm:$0xff]  ;;  %v6383_v42 = vld [vmem:[%s6198_s27 + $0xd8] sm:$0xff] }
  0x20   : > { %5592 = vmatprep.mubr.msk.f32.mxu0 %vm294_vm0, %v6266_v19  ;;  %7272 = vst [vmem:[#allocation15_spill] sm:$0xff] %v6357_v36  ;;  %v6360_v37 = vld [vmem:[%s6198_s27 + $0xc9] sm:$0xff]  ;;  %v6363_v38 = vld [vmem:[%s6198_s27 + $0xc0] sm:$0xff]  ;;  %v6386_v43 = vld [vmem:[%s6198_s27 + $0x32] sm:$0xff] }
  0x21   : > { %v6366_v39 = vld [vmem:[%s6198_s27 + $0x1a] sm:$0xff]  ;;  %v6377_v40 = vld [vmem:[%s6198_s27 + $0xc8] sm:$0xff]  ;;  %v6409_v47 = vld [vmem:[%s6198_s27 + $0xf0] sm:$0xff] }
  0x22   : > { %5393 = vmatmul.mubr.msk.f32.gmra.mrb[6].mxu1 %vm294_vm0, %v6277_v20  ;;  %7273 = vst [vmem:[#allocation16_spill] sm:$0xff] %v6377_v40  ;;  %v6380_v41 = vld [vmem:[%s6198_s27 + $0x22] sm:$0xff]  ;;  %v6404_v46 = vld [vmem:[%s6198_s27 + $0x3a] sm:$0xff]  ;;  %v6412_v48 = vld [vmem:[%s6198_s27 + $0x4a] sm:$0xff] }
  0x23   : > { %5593 = vmatmul.mubr.msk.f32.gmra.mrb[6].mxu0 %vm294_vm0, %v6280_v21  ;;  %5395 = vmatprep.mubr.msk.f32.mxu1 %vm294_vm0, %v6283_v22  ;;  %v6401_v45 = vld [vmem:[%s6198_s27 + $0xe0] sm:$0xff]  ;;  %v6424_v49 = vld [vmem:[%s6198_s27 + $0xf8] sm:$0xff]  ;;  %v6430_v51 = vld [vmem:[%s6198_s27 + $0x108] sm:$0xff] }
  0x24   : > { %5595 = vmatprep.mubr.msk.f32.mxu0 %vm294_vm0, %v6286_v23  ;;  %v6427_v50 = vld [vmem:[%s6198_s27 + $0x52] sm:$0xff]  ;;  %v6433_v52 = vld [vmem:[%s6198_s27 + $0x62] sm:$0xff]  ;;  %v6447_v54 = vld [vmem:[%s6198_s27 + $0x6a] sm:$0xff] }
  0x25   : > { %v6444_v53 = vld [vmem:[%s6198_s27 + $0x110] sm:$0xff]  ;;  %v6450_v55 = vld [vmem:[%s6198_s27 + $0x120] sm:$0xff]  ;;  %v6464_v57 = vld [vmem:[%s6198_s27 + $0x128] sm:$0xff] }
  0x26   : > { %5396 = vmatmul.mubr.msk.f32.gmra.mrb[8].mxu1 %vm294_vm0, %v6297_v24  ;;  %v6453_v56 = vld [vmem:[%s6198_s27 + $0x7a] sm:$0xff]  ;;  %v6467_v58 = vld [vmem:[%s6198_s27 + $0x82] sm:$0xff]  ;;  %v6473_v60 = vld [vmem:[%s6198_s27 + $0x92] sm:$0xff] }
  0x27   : > { %5596 = vmatmul.mubr.msk.f32.gmra.mrb[8].mxu0 %vm294_vm0, %v6300_v25  ;;  %5398 = vmatprep.mubr.msk.f32.mxu1 %vm294_vm0, %v6303_v26  ;;  %v6470_v59 = vld [vmem:[%s6198_s27 + $0x138] sm:$0xff]  ;;  %7274 = vst [vmem:[#allocation17_spill] sm:$0xff] %v6473_v60  ;;  %v6484_v61 = vld [vmem:[%s6198_s27 + $0x140] sm:$0xff]  ;;  %v6490_v63 = vld [vmem:[%s6198_s27 + $0x150] sm:$0xff] }
  0x28   : > { %5598 = vmatprep.mubr.msk.f32.mxu0 %vm294_vm0, %v6306_v27  ;;  %v6487_v62 = vld [vmem:[%s6198_s27 + $0x9a] sm:$0xff]  ;;  %v6493_v0 = vld [vmem:[%s6198_s27 + $0xaa] sm:$0xff]  ;;  %v6507_v3 = vld [vmem:[%s6198_s27 + $0xb2] sm:$0xff] }
  0x29   : > { %7275 = vst [vmem:[#allocation18_spill] sm:$0xff] %v6487_v62  ;;  %7276 = vst [vmem:[#allocation19_spill] sm:$0xff] %v6493_v0  ;;  %v6504_v2 = vld [vmem:[%s6198_s27 + $0x158] sm:$0xff]  ;;  %v6510_v4 = vld [vmem:[%s6198_s27 + $0x168] sm:$0xff] }
  0x2a   : > { %5399 = vmatmul.mubr.msk.f32.gmra.mrb[10].mxu1 %vm294_vm0, %v6317_v28  ;;  %7277 = vst [vmem:[#allocation20_spill] sm:$0xff] %v6504_v2  ;;  %7278 = vst [vmem:[#allocation21_spill] sm:$0xff] %v6507_v3  ;;  %v6513_v6 = vld [vmem:[%s6198_s27 + $0xc2] sm:$0xff]  ;;  %v6527_v12 = vld [vmem:[%s6198_s27 + $0xca] sm:$0xff] }
  0x2b   : > { %5599 = vmatmul.mubr.msk.f32.gmra.mrb[10].mxu0 %vm294_vm0, %v6320_v29  ;;  %5401 = vmatprep.mubr.msk.f32.mxu1 %vm294_vm0, %v6323_v30  ;;  %7279 = vst [vmem:[#allocation22_spill] sm:$0xff] %v6510_v4  ;;  %7280 = vst [vmem:[#allocation23_spill] sm:$0xff] %v6513_v6  ;;  %v680_v8 = vld [vmem:[%s6198_s27 + $0x1] sm:$0xff] }
  0x2c   : > { %5601 = vmatprep.mubr.msk.f32.mxu0 %vm294_vm0, %v6326_v31 }
  0x2e   : > { %5402 = vmatmul.mubr.msk.f32.gmra.mrb[12].mxu1 %vm294_vm0, %v6337_v32 }
  0x2f   : > { %5602 = vmatmul.mubr.msk.f32.gmra.mrb[12].mxu0 %vm294_vm0, %v6340_v33  ;;  %5404 = vmatprep.mubr.msk.f32.mxu1 %vm294_vm0, %v6343_v34 }
  0x30   : > { %5604 = vmatprep.mubr.msk.f32.mxu0 %vm294_vm0, %v6346_v35 }
  0x32   : > { %5405 = vmatmul.mubr.msk.f32.gmra.mrb[14].mxu1 %vm294_vm0, %v6357_v36 }
  0x33   : > { %5605 = vmatmul.mubr.msk.f32.gmra.mrb[14].mxu0 %vm294_vm0, %v6360_v37  ;;  %5407 = vmatprep.mubr.msk.f32.mxu1 %vm294_vm0, %v6363_v38 }
  0x34   : > { %5633 = vmatprep.mubr.msk.f32.mxu0 %vm294_vm0, %v6366_v39 }
  0x36   : > { %5408 = vmatmul.mubr.msk.f32.gmra.mrb[16].mxu1 %vm294_vm0, %v6377_v40 }
  0x37   : > { %5634 = vmatmul.mubr.msk.f32.vlgmr.msra.gmra.mrb[0].mxu0 %vm294_vm0, %v6380_v41  ;;  %5410 = vmatprep.mubr.msk.f32.mxu1 %vm294_vm0, %v6383_v42 }
  0x38   : > { %5682 = vmatpush3.msra.mxu0 %v6223_v10  ;;  %5636 = vmatprep.mubr.msk.f32.mxu0 %vm294_vm0, %v6386_v43  ;;  %v6524_v10 = vld [vmem:[%s6198_s27 + $0x170] sm:$0xff] }
  0x39   : > { %5731 = vmatprep.subr.mxu0 %v6391_v44  ;;  %7281 = vst [vmem:[#allocation24_spill] sm:$0xff] %v6524_v10 }
  0x3a   : > { %5411 = vmatmul.mubr.msk.f32.gmra.mrb[18].mxu1 %vm294_vm0, %v6401_v45 }
  0x3b   : > { %5637 = vmatmul.mubr.msk.f32.gmra.mrb[2].mxu0 %vm294_vm0, %v6404_v46  ;;  %5413 = vmatprep.mubr.msk.f32.mxu1 %vm294_vm0, %v6409_v47 }
  0x3c   : > { %5639 = vmatprep.mubr.msk.f32.mxu0 %vm294_vm0, %v6412_v48 }
  0x3e   : > { %5414 = vmatmul.mubr.msk.f32.gmra.mrb[20].mxu1 %vm294_vm0, %v6424_v49 }
  0x3f   : > { %5640 = vmatmul.mubr.msk.f32.gmra.mrb[4].mxu0 %vm294_vm0, %v6427_v50  ;;  %5416 = vmatprep.mubr.msk.f32.mxu1 %vm294_vm0, %v6430_v51 }
  0x40   : > { %5642 = vmatprep.mubr.msk.f32.mxu0 %vm294_vm0, %v6433_v52 }
  0x42   : > { %5417 = vmatmul.mubr.msk.f32.gmra.mrb[22].mxu1 %vm294_vm0, %v6444_v53 }
  0x43   : > { %5643 = vmatmul.mubr.msk.f32.gmra.mrb[6].mxu0 %vm294_vm0, %v6447_v54  ;;  %5419 = vmatprep.mubr.msk.f32.mxu1 %vm294_vm0, %v6450_v55 }
  0x44   : > { %5645 = vmatprep.mubr.msk.f32.mxu0 %vm294_vm0, %v6453_v56 }
  0x46   : > { %5420 = vmatmul.mubr.msk.f32.gmra.mrb[24].mxu1 %vm294_vm0, %v6464_v57 }
  0x47   : > { %5646 = vmatmul.mubr.msk.f32.gmra.mrb[8].mxu0 %vm294_vm0, %v6467_v58  ;;  %5422 = vmatprep.mubr.msk.f32.mxu1 %vm294_vm0, %v6470_v59 }
  0x48   : > { %5648 = vmatprep.mubr.msk.f32.mxu0 %vm294_vm0, %v6473_v60  ;;  %v6550_v60 = vld [vmem:[%s7207_s1 + $0x18] sm:$0xff] }
  0x4a   : > { %5423 = vmatmul.mubr.msk.f32.gmra.mrb[26].mxu1 %vm294_vm0, %v6484_v61 }
  0x4b   : > { %5649 = vmatmul.mubr.msk.f32.gmra.mrb[10].mxu0 %vm294_vm0, %v6487_v62  ;;  %5425 = vmatprep.mubr.msk.f32.mxu1 %vm294_vm0, %v6490_v63  ;;  %v6545_v62 = vld [vmem:[%s6198_s27 + $0xf2] sm:$0xff] }
  0x4c   : > { %5651 = vmatprep.mubr.msk.f32.mxu0 %vm294_vm0, %v6493_v0  ;;  %v6531_v0 = vld [vmem:[%s6198_s27 + $0xda] sm:$0xff] }
  0x4d   : > { %7282 = vst [vmem:[#allocation25_spill] sm:$0xff] %v6531_v0 }
  0x4e   : > { %5426 = vmatmul.mubr.msk.f32.gmra.mrb[28].mxu1 %vm294_vm0, %v6504_v2 }
  0x4f   : > { %5652 = vmatmul.mubr.msk.f32.gmra.mrb[12].mxu0 %vm294_vm0, %v6507_v3  ;;  %5428 = vmatprep.mubr.msk.f32.mxu1 %vm294_vm0, %v6510_v4  ;;  %v6542_v3 = vld [vmem:[%s6198_s27 + $0xe2] sm:$0xff] }
  0x50   : > { %5654 = vmatprep.mubr.msk.f32.mxu0 %vm294_vm0, %v6513_v6  ;;  %v681_v6 = vld [vmem:[%s6198_s27 + $0x9] sm:$0xff] }
  0x52   : > { %5429 = vmatmul.mubr.msk.f32.gmra.mrb[30].mxu1 %vm294_vm0, %v6524_v10 }
  0x53   : > { %5655 = vmatmul.mubr.msk.f32.gmra.mrb[14].mxu0 %vm294_vm0, %v6527_v12  ;;  %5433 = vmatprep.mubr.msk.f32.mxu1 %vm294_vm0, %v680_v8  ;;  %v6559_v8 = vld [vmem:[%s6198_s27 + $0xfa] sm:$0xff] }
  0x54   : > { %5657 = vmatprep.mubr.msk.f32.mxu0 %vm294_vm0, %v6531_v0  ;;  %v6564_v0 = vld [vmem:[%s6198_s27 + $0x10a] sm:$0xff] }
  0x56   : > { %5434 = vmatmul.mubr.msk.f32.vlgmr.msra.gmra.mrb[0].mxu1 %vm294_vm0, %v681_v6  ;;  %v6593_v6 = vld [vmem:[%s6198_s27 + $0x13a] sm:$0xff] }
  0x57   : > { %5658 = vmatmul.mubr.msk.f32.gmra.mrb[16].mxu0 %vm294_vm0, %v6542_v3  ;;  %5482 = vmatpush3.msra.mxu1 %v6228_v11  ;;  %v6579_v11 = vld [vmem:[%s6198_s27 + $0x122] sm:$0xff]  ;;  %7286 = vst [vmem:[#allocation29_spill] sm:$0xff] %v6593_v6 }
  0x58   : > { %5436 = vmatprep.mubr.msk.f32.mxu1 %vm294_vm0, %v6202_v5  ;;  %5660 = vmatprep.mubr.msk.f32.mxu0 %vm294_vm0, %v6545_v62  ;;  %v6576_v5 = vld [vmem:[%s6198_s27 + $0x112] sm:$0xff]  ;;  %7284 = vst [vmem:[#allocation27_spill] sm:$0xff] %v6579_v11 }
  0x59   : > { %5531 = vmatprep.subr.mxu1 %v6550_v60  ;;  %7283 = vst [vmem:[#allocation26_spill] sm:$0xff] %v6576_v5 }
  0x5a   : > { %5437 = vmatmul.mubr.msk.f32.gmra.mrb[2].mxu1 %vm294_vm0, %v6209_v7  ;;  %v6590_v7 = vld [vmem:[%s6198_s27 + $0x12a] sm:$0xff] }
  0x5b   : > { %5661 = vmatmul.mubr.msk.f32.gmra.mrb[18].mxu0 %vm294_vm0, %v6559_v8  ;;  %5439 = vmatprep.mubr.msk.f32.mxu1 %vm294_vm0, %v6215_v9  ;;  %7285 = vst [vmem:[#allocation28_spill] sm:$0xff] %v6590_v7 }
  0x5c   : > { %5663 = vmatprep.mubr.msk.f32.mxu0 %vm294_vm0, %v6564_v0 }
  0x5e   : > { %5440 = vmatmul.mubr.msk.f32.gmra.mrb[4].mxu1 %vm294_vm0, %v6234_v13 }
  0x5f   : > { %5664 = vmatmul.mubr.msk.f32.gmra.mrb[20].mxu0 %vm294_vm0, %v6576_v5  ;;  %5442 = vmatprep.mubr.msk.f32.mxu1 %vm294_vm0, %v6244_v15  ;;  %v6604_v5 = vld [vmem:[%s6198_s27 + $0x142] sm:$0xff] }
  0x60   : > { %5666 = vmatprep.mubr.msk.f32.mxu0 %vm294_vm0, %v6579_v11  ;;  %7287 = vst [vmem:[#allocation30_spill] sm:$0xff] %v6604_v5  ;;  %v6607_v11 = vld [vmem:[%s6198_s27 + $0x152] sm:$0xff] }
  0x61   : > { %7288 = vst [vmem:[#allocation31_spill] sm:$0xff] %v6607_v11 }
  0x62   : > { %5443 = vmatmul.mubr.msk.f32.gmra.mrb[6].mxu1 %vm294_vm0, %v6260_v17 }
  0x63   : > { %5667 = vmatmul.mubr.msk.f32.gmra.mrb[22].mxu0 %vm294_vm0, %v6590_v7  ;;  %5445 = vmatprep.mubr.msk.f32.mxu1 %vm294_vm0, %v6266_v19  ;;  %v6618_v7 = vld [vmem:[%s6198_s27 + $0x15a] sm:$0xff] }
  0x64   : > { %5669 = vmatprep.mubr.msk.f32.mxu0 %vm294_vm0, %v6593_v6  ;;  %7289 = vst [vmem:[#allocation32_spill] sm:$0xff] %v6618_v7  ;;  %v6621_v6 = vld [vmem:[%s6198_s27 + $0x16a] sm:$0xff] }
  0x66   : > { %5446 = vmatmul.mubr.msk.f32.gmra.mrb[8].mxu1 %vm294_vm0, %v6280_v21 }
  0x67   : > { %5670 = vmatmul.mubr.msk.f32.gmra.mrb[24].mxu0 %vm294_vm0, %v6604_v5  ;;  %5448 = vmatprep.mubr.msk.f32.mxu1 %vm294_vm0, %v6286_v23  ;;  %v6632_v5 = vld [vmem:[%s6198_s27 + $0x172] sm:$0xff] }
  0x68   : > { %5672 = vmatprep.mubr.msk.f32.mxu0 %vm294_vm0, %v6607_v11  ;;  %7290 = vst [vmem:[#allocation33_spill] sm:$0xff] %v6632_v5  ;;  %v6635_v11 = vld [vmem:[%s6198_s27 + $0x182] sm:$0xff] }
  0x69   : > { %7291 = vst [vmem:[#allocation34_spill] sm:$0xff] %v6635_v11 }
  0x6a   : > { %5449 = vmatmul.mubr.msk.f32.gmra.mrb[10].mxu1 %vm294_vm0, %v6300_v25 }
  0x6b   : > { %5673 = vmatmul.mubr.msk.f32.gmra.mrb[26].mxu0 %vm294_vm0, %v6618_v7  ;;  %5451 = vmatprep.mubr.msk.f32.mxu1 %vm294_vm0, %v6306_v27  ;;  %v6646_v7 = vld [vmem:[%s6198_s27 + $0x18a] sm:$0xff] }
  0x6c   : > { %5675 = vmatprep.mubr.msk.f32.mxu0 %vm294_vm0, %v6621_v6  ;;  %7292 = vst [vmem:[#allocation35_spill] sm:$0xff] %v6646_v7 }
  0x6e   : > { %5452 = vmatmul.mubr.msk.f32.gmra.mrb[12].mxu1 %vm294_vm0, %v6320_v29 }
  0x6f   : > { %5676 = vmatmul.mubr.msk.f32.gmra.mrb[28].mxu0 %vm294_vm0, %v6632_v5  ;;  %5454 = vmatprep.mubr.msk.f32.mxu1 %vm294_vm0, %v6326_v31  ;;  %v6657_v5 = vld [vmem:[%s6198_s27 + $0xd9] sm:$0xff] }
  0x70   : > { %5678 = vmatprep.mubr.msk.f32.mxu0 %vm294_vm0, %v6635_v11  ;;  %v6662_v11 = vld [vmem:[%s7207_s1 + $0x40] sm:$0xff] }
  0x72   : > { %5455 = vmatmul.mubr.msk.f32.gmra.mrb[14].mxu1 %vm294_vm0, %v6340_v33 }
  0x73   : > { %5679 = vmatmul.mubr.msk.f32.gmra.mrb[30].mxu0 %vm294_vm0, %v6646_v7  ;;  %5457 = vmatprep.mubr.msk.f32.mxu1 %vm294_vm0, %v6346_v35  ;;  %v6672_v7 = vld [vmem:[%s6198_s27 + $0xe1] sm:$0xff] }
  0x74   : > { %5683 = vmatprep.mubr.msk.f32.mxu0 %vm294_vm0, %v6241_v14  ;;  %v6677_v14 = vld [vmem:[%s6198_s27 + $0xf1] sm:$0xff] }
  0x76   : > { %5458 = vmatmul.mubr.msk.f32.gmra.mrb[16].mxu1 %vm294_vm0, %v6360_v37 }
  0x77   : > { %5684 = vmatmul.mubr.msk.f32.vlgmr.msra.gmra.mrb[0].mxu0 %vm294_vm0, %v6257_v16  ;;  %5460 = vmatprep.mubr.msk.f32.mxu1 %vm294_vm0, %v6657_v5 }
  0x78   : > { %5732 = vmatpush3.msra.mxu0 %v6391_v44  ;;  %5686 = vmatprep.mubr.msk.f32.mxu0 %vm294_vm0, %v6263_v18  ;;  %v6689_v44 = vld [vmem:[%s6198_s27 + $0xf9] sm:$0xff]  ;;  %v6692_v18 = vld [vmem:[%s6198_s27 + $0x109] sm:$0xff] }
  0x79   : > { %5781 = vmatprep.subr.mxu0 %v6662_v11 }
  0x7a   : > { %5461 = vmatmul.mubr.msk.f32.gmra.mrb[18].mxu1 %vm294_vm0, %v6672_v7 }
  0x7b   : > { %5687 = vmatmul.mubr.msk.f32.gmra.mrb[2].mxu0 %vm294_vm0, %v6277_v20  ;;  %5463 = vmatprep.mubr.msk.f32.mxu1 %vm294_vm0, %v6677_v14  ;;  %v6703_v20 = vld [vmem:[%s6198_s27 + $0x111] sm:$0xff] }
  0x7c   : > { %5689 = vmatprep.mubr.msk.f32.mxu0 %vm294_vm0, %v6283_v22  ;;  %v6706_v22 = vld [vmem:[%s6198_s27 + $0x121] sm:$0xff] }
  0x7e   : > { %5464 = vmatmul.mubr.msk.f32.gmra.mrb[20].mxu1 %vm294_vm0, %v6689_v44 }
  0x7f   : > { %5690 = vmatmul.mubr.msk.f32.gmra.mrb[4].mxu0 %vm294_vm0, %v6297_v24  ;;  %5466 = vmatprep.mubr.msk.f32.mxu1 %vm294_vm0, %v6692_v18  ;;  %v6717_v24 = vld [vmem:[%s6198_s27 + $0x129] sm:$0xff] }
  0x80   : > { %5692 = vmatprep.mubr.msk.f32.mxu0 %vm294_vm0, %v6303_v26  ;;  %v6720_v26 = vld [vmem:[%s6198_s27 + $0x139] sm:$0xff] }
  0x82   : > { %5467 = vmatmul.mubr.msk.f32.gmra.mrb[22].mxu1 %vm294_vm0, %v6703_v20 }
  0x83   : > { %5693 = vmatmul.mubr.msk.f32.gmra.mrb[6].mxu0 %vm294_vm0, %v6317_v28  ;;  %5469 = vmatprep.mubr.msk.f32.mxu1 %vm294_vm0, %v6706_v22  ;;  %v6731_v28 = vld [vmem:[%s6198_s27 + $0x141] sm:$0xff] }
  0x84   : > { %5695 = vmatprep.mubr.msk.f32.mxu0 %vm294_vm0, %v6323_v30  ;;  %v6734_v30 = vld [vmem:[%s6198_s27 + $0x151] sm:$0xff] }
  0x85   : > { %7293 = vst [vmem:[#allocation36_spill] sm:$0xff] %v6734_v30 }
  0x86   : > { %5470 = vmatmul.mubr.msk.f32.gmra.mrb[24].mxu1 %vm294_vm0, %v6717_v24 }
  0x87   : > { %5696 = vmatmul.mubr.msk.f32.gmra.mrb[8].mxu0 %vm294_vm0, %v6337_v32  ;;  %5472 = vmatprep.mubr.msk.f32.mxu1 %vm294_vm0, %v6720_v26  ;;  %v6745_v32 = vld [vmem:[%s6198_s27 + $0x159] sm:$0xff] }
  0x88   : > { %5698 = vmatprep.mubr.msk.f32.mxu0 %vm294_vm0, %v6343_v34  ;;  %v6748_v34 = vld [vmem:[%s6198_s27 + $0x169] sm:$0xff] }
  0x8a   : > { %5473 = vmatmul.mubr.msk.f32.gmra.mrb[26].mxu1 %vm294_vm0, %v6731_v28 }
  0x8b   : > { %5699 = vmatmul.mubr.msk.f32.gmra.mrb[10].mxu0 %vm294_vm0, %v6357_v36  ;;  %5475 = vmatprep.mubr.msk.f32.mxu1 %vm294_vm0, %v6734_v30  ;;  %v6759_v36 = vld [vmem:[%s6198_s27 + $0x171] sm:$0xff]  ;;  %v1131_v30 = vld [vmem:[%s6198_s27 + $0x2] sm:$0xff] }
  0x8c   : > { %5701 = vmatprep.mubr.msk.f32.mxu0 %vm294_vm0, %v6363_v38 }
  0x8e   : > { %5476 = vmatmul.mubr.msk.f32.gmra.mrb[28].mxu1 %vm294_vm0, %v6745_v32 }
  0x8f   : > { %5702 = vmatmul.mubr.msk.f32.gmra.mrb[12].mxu0 %vm294_vm0, %v6377_v40  ;;  %5478 = vmatprep.mubr.msk.f32.mxu1 %vm294_vm0, %v6748_v34  ;;  %v1132_v40 = vld [vmem:[%s6198_s27 + $0xa] sm:$0xff] }
  0x90   : > { %5704 = vmatprep.mubr.msk.f32.mxu0 %vm294_vm0, %v6383_v42 }
  0x92   : > { %5479 = vmatmul.mubr.msk.f32.gmra.mrb[30].mxu1 %vm294_vm0, %v6759_v36 }
  0x93   : > { %5705 = vmatmul.mubr.msk.f32.gmra.mrb[14].mxu0 %vm294_vm0, %v6401_v45  ;;  %5483 = vmatprep.mubr.msk.f32.mxu1 %vm294_vm0, %v1131_v30  ;;  %v6812_v30 = vld [vmem:[%s6198_s27 + $0x180] sm:$0xff] }
  0x94   : > { %5707 = vmatprep.mubr.msk.f32.mxu0 %vm294_vm0, %v6409_v47  ;;  %7294 = vst [vmem:[#allocation37_spill] sm:$0xff] %v6812_v30 }
  0x96   : > { %5484 = vmatmul.mubr.msk.f32.vlgmr.msra.gmra.mrb[0].mxu1 %vm294_vm0, %v1132_v40  ;;  %v6823_v40 = vld [vmem:[%s6198_s27 + $0x188] sm:$0xff] }
  0x97   : > { %5708 = vmatmul.mubr.msk.f32.gmra.mrb[16].mxu0 %vm294_vm0, %v6424_v49  ;;  %5532 = vmatpush3.msra.mxu1 %v6550_v60  ;;  %v7296_v60 = vld [vmem:[#allocation18_spill] sm:$0xff] }
  0x98   : > { %5486 = vmatprep.mubr.msk.f32.mxu1 %vm294_vm0, %v6366_v39  ;;  %5710 = vmatprep.mubr.msk.f32.mxu0 %vm294_vm0, %v6430_v51  ;;  %v7295_v39 = vld [vmem:[#allocation17_spill] sm:$0xff] }
  0x99   : > { %5831 = vmatprep.subr.mxu1 %v6182_v1 }
  0x9a   : > { %5487 = vmatmul.mubr.msk.f32.gmra.mrb[2].mxu1 %vm294_vm0, %v6380_v41  ;;  %v4915_v41 = vld [vmem:[%s6198_s27 + $0x198] sm:$0xff] }
  0x9b   : > { %5711 = vmatmul.mubr.msk.f32.gmra.mrb[18].mxu0 %vm294_vm0, %v6444_v53  ;;  %5489 = vmatprep.mubr.msk.f32.mxu1 %vm294_vm0, %v6386_v43 }
  0x9c   : > { %5713 = vmatprep.mubr.msk.f32.mxu0 %vm294_vm0, %v6450_v55 }
  0x9e   : > { %5490 = vmatmul.mubr.msk.f32.gmra.mrb[4].mxu1 %vm294_vm0, %v6404_v46 }
  0x9f   : > { %5714 = vmatmul.mubr.msk.f32.gmra.mrb[20].mxu0 %vm294_vm0, %v6464_v57  ;;  %5492 = vmatprep.mubr.msk.f32.mxu1 %vm294_vm0, %v6412_v48 }
  0xa0   : > { %5716 = vmatprep.mubr.msk.f32.mxu0 %vm294_vm0, %v6470_v59 }
  0xa2   : > { %5493 = vmatmul.mubr.msk.f32.gmra.mrb[6].mxu1 %vm294_vm0, %v6427_v50 }
  0xa3   : > { %5717 = vmatmul.mubr.msk.f32.gmra.mrb[22].mxu0 %vm294_vm0, %v6484_v61  ;;  %5495 = vmatprep.mubr.msk.f32.mxu1 %vm294_vm0, %v6433_v52 }
  0xa4   : > { %5719 = vmatprep.mubr.msk.f32.mxu0 %vm294_vm0, %v6490_v63 }
  0xa6   : > { %5496 = vmatmul.mubr.msk.f32.gmra.mrb[8].mxu1 %vm294_vm0, %v6447_v54 }
  0xa7   : > { %5720 = vmatmul.mubr.msk.f32.gmra.mrb[24].mxu0 %vm294_vm0, %v6504_v2  ;;  %5498 = vmatprep.mubr.msk.f32.mxu1 %vm294_vm0, %v6453_v56  ;;  %v7298_v2 = vld [vmem:[#allocation21_spill] sm:$0xff] }
  0xa8   : > { %5722 = vmatprep.mubr.msk.f32.mxu0 %vm294_vm0, %v6510_v4  ;;  %v7297_v4 = vld [vmem:[#allocation19_spill] sm:$0xff] }
  0xaa   : > { %5499 = vmatmul.mubr.msk.f32.gmra.mrb[10].mxu1 %vm294_vm0, %v6467_v58 }
  0xab   : > { %5723 = vmatmul.mubr.msk.f32.gmra.mrb[26].mxu0 %vm294_vm0, %v6524_v10  ;;  %5501 = vmatprep.mubr.msk.f32.mxu1 %vm294_vm0, %v7295_v39  ;;  %v4916_v10 = vld [vmem:[%s6198_s27 + $0x1a0] sm:$0xff] }
  0xac   : > { %5725 = vmatprep.mubr.msk.f32.mxu0 %vm294_vm0, %v6812_v30  ;;  %v7299_v30 = vld [vmem:[#allocation23_spill] sm:$0xff] }
  0xae   : > { %5502 = vmatmul.mubr.msk.f32.gmra.mrb[12].mxu1 %vm294_vm0, %v7296_v60 }
  0xaf   : > { %5726 = vmatmul.mubr.msk.f32.gmra.mrb[28].mxu0 %vm294_vm0, %v6823_v40  ;;  %5504 = vmatprep.mubr.msk.f32.mxu1 %vm294_vm0, %v7297_v4 }
  0xb0   : > { %5728 = vmatprep.mubr.msk.f32.mxu0 %vm294_vm0, %v4915_v41  ;;  %v7300_v41 = vld [vmem:[#allocation25_spill] sm:$0xff] }
  0xb2   : > { %5505 = vmatmul.mubr.msk.f32.gmra.mrb[14].mxu1 %vm294_vm0, %v7298_v2 }
  0xb3   : > { %5729 = vmatmul.mubr.msk.f32.gmra.mrb[30].mxu0 %vm294_vm0, %v4916_v10  ;;  %5507 = vmatprep.mubr.msk.f32.mxu1 %vm294_vm0, %v7299_v30  ;;  %v7317_v10 = vld [vmem:[#allocation36_spill] sm:$0xff] }
  0xb4   : > { %5733 = vmatprep.mubr.msk.f32.mxu0 %vm294_vm0, %v6215_v9  ;;  %v7301_v9 = vld [vmem:[#allocation26_spill] sm:$0xff] }
  0xb6   : > { %5508 = vmatmul.mubr.msk.f32.gmra.mrb[16].mxu1 %vm294_vm0, %v6527_v12 }
  0xb7   : > { %5734 = vmatmul.mubr.msk.f32.vlgmr.msra.gmra.mrb[0].mxu0 %vm294_vm0, %v6234_v13  ;;  %5510 = vmatprep.mubr.msk.f32.mxu1 %vm294_vm0, %v7300_v41  ;;  %v7302_v13 = vld [vmem:[#allocation27_spill] sm:$0xff] }
  0xb8   : > { %5782 = vmatpush3.msra.mxu0 %v6662_v11  ;;  %5736 = vmatprep.mubr.msk.f32.mxu0 %vm294_vm0, %v6244_v15  ;;  %v7303_v15 = vld [vmem:[#allocation28_spill] sm:$0xff]  ;;  %v7318_v11 = vld [vmem:[#allocation11_spill] sm:$0xff] }
  0xba   : > { %5511 = vmatmul.mubr.msk.f32.gmra.mrb[18].mxu1 %vm294_vm0, %v6542_v3 }
  0xbb   : > { %5737 = vmatmul.mubr.msk.f32.gmra.mrb[2].mxu0 %vm294_vm0, %v6260_v17  ;;  %5513 = vmatprep.mubr.msk.f32.mxu1 %vm294_vm0, %v6545_v62  ;;  %v7304_v17 = vld [vmem:[#allocation29_spill] sm:$0xff] }
  0xbc   : > { %5739 = vmatprep.mubr.msk.f32.mxu0 %vm294_vm0, %v6266_v19  ;;  %v7305_v19 = vld [vmem:[#allocation30_spill] sm:$0xff] }
  0xbe   : > { %5514 = vmatmul.mubr.msk.f32.gmra.mrb[20].mxu1 %vm294_vm0, %v6559_v8 }
  0xbf   : > { %5740 = vmatmul.mubr.msk.f32.gmra.mrb[4].mxu0 %vm294_vm0, %v6280_v21  ;;  %5516 = vmatprep.mubr.msk.f32.mxu1 %vm294_vm0, %v6564_v0  ;;  %v7306_v21 = vld [vmem:[#allocation31_spill] sm:$0xff] }
  0xc0   : > { %5742 = vmatprep.mubr.msk.f32.mxu0 %vm294_vm0, %v6286_v23  ;;  %v7307_v23 = vld [vmem:[#allocation32_spill] sm:$0xff] }
  0xc2   : > { %5517 = vmatmul.mubr.msk.f32.gmra.mrb[22].mxu1 %vm294_vm0, %v7301_v9 }
  0xc3   : > { %5743 = vmatmul.mubr.msk.f32.gmra.mrb[6].mxu0 %vm294_vm0, %v6300_v25  ;;  %5519 = vmatprep.mubr.msk.f32.mxu1 %vm294_vm0, %v7302_v13  ;;  %v7308_v25 = vld [vmem:[#allocation33_spill] sm:$0xff] }
  0xc4   : > { %5745 = vmatprep.mubr.msk.f32.mxu0 %vm294_vm0, %v6306_v27  ;;  %v7309_v27 = vld [vmem:[#allocation3_spill] sm:$0xff] }
  0xc6   : > { %5520 = vmatmul.mubr.msk.f32.gmra.mrb[24].mxu1 %vm294_vm0, %v7303_v15 }
  0xc7   : > { %5746 = vmatmul.mubr.msk.f32.gmra.mrb[8].mxu0 %vm294_vm0, %v6320_v29  ;;  %5522 = vmatprep.mubr.msk.f32.mxu1 %vm294_vm0, %v7304_v17  ;;  %v7310_v29 = vld [vmem:[#allocation4_spill] sm:$0xff] }
  0xc8   : > { %5748 = vmatprep.mubr.msk.f32.mxu0 %vm294_vm0, %v6326_v31  ;;  %v7311_v31 = vld [vmem:[#allocation5_spill] sm:$0xff] }
  0xca   : > { %5523 = vmatmul.mubr.msk.f32.gmra.mrb[26].mxu1 %vm294_vm0, %v7305_v19 }
  0xcb   : > { %5749 = vmatmul.mubr.msk.f32.gmra.mrb[10].mxu0 %vm294_vm0, %v6340_v33  ;;  %5525 = vmatprep.mubr.msk.f32.mxu1 %vm294_vm0, %v7306_v21  ;;  %v7312_v33 = vld [vmem:[#allocation6_spill] sm:$0xff] }
  0xcc   : > { %5751 = vmatprep.mubr.msk.f32.mxu0 %vm294_vm0, %v6346_v35  ;;  %v7314_v35 = vld [vmem:[#allocation8_spill] sm:$0xff] }
  0xce   : > { %5526 = vmatmul.mubr.msk.f32.gmra.mrb[28].mxu1 %vm294_vm0, %v7307_v23 }
  0xcf   : > { %5752 = vmatmul.mubr.msk.f32.gmra.mrb[12].mxu0 %vm294_vm0, %v6360_v37  ;;  %5528 = vmatprep.mubr.msk.f32.mxu1 %vm294_vm0, %v6621_v6  ;;  %v7316_v37 = vld [vmem:[#allocation10_spill] sm:$0xff] }
  0xd0   : > { %5754 = vmatprep.mubr.msk.f32.mxu0 %vm294_vm0, %v6657_v5 }
  0xd2   : > { %5529 = vmatmul.mubr.msk.f32.gmra.mrb[30].mxu1 %vm294_vm0, %v7308_v25 }
  0xd3   : > { %5755 = vmatmul.mubr.msk.f32.gmra.mrb[14].mxu0 %vm294_vm0, %v6672_v7  ;;  %5533 = vmatprep.mubr.msk.f32.mxu1 %vm294_vm0, %v7309_v27  ;;  %v7319_v27 = vld [vmem:[#allocation12_spill] sm:$0xff] }
  0xd4   : > { %5757 = vmatprep.mubr.msk.f32.mxu0 %vm294_vm0, %v6677_v14 }
  0xd6   : > { %5534 = vmatmul.mubr.msk.f32.vlgmr.msra.gmra.mrb[0].mxu1 %vm294_vm0, %v7310_v29  ;;  %v6948_v29 = vld [vmem:[%s6198_s27 + $0x181] sm:$0xff] }
  0xd7   : > { %5758 = vmatmul.mubr.msk.f32.gmra.mrb[16].mxu0 %vm294_vm0, %v6689_v44  ;;  %5832 = vmatpush3.msra.mxu1 %v6182_v1  ;;  %v7313_v1 = vld [vmem:[#allocation7_spill] sm:$0xff] }
  0xd8   : > { %5536 = vmatprep.mubr.msk.f32.mxu1 %vm294_vm0, %v7311_v31  ;;  %5760 = vmatprep.mubr.msk.f32.mxu0 %vm294_vm0, %v6692_v18  ;;  %v7320_v31 = vld [vmem:[#allocation13_spill] sm:$0xff] }
  0xda   : > { %5537 = vmatmul.mubr.msk.f32.gmra.mrb[2].mxu1 %vm294_vm0, %v6257_v16  ;;  %v7315_v16 = vld [vmem:[#allocation9_spill] sm:$0xff] }
  0xdb   : > { %5761 = vmatmul.mubr.msk.f32.gmra.mrb[18].mxu0 %vm294_vm0, %v6703_v20  ;;  %5539 = vmatprep.mubr.msk.f32.mxu1 %vm294_vm0, %v7312_v33  ;;  %v7321_v33 = vld [vmem:[#allocation14_spill] sm:$0xff] }
  0xdc   : > { %5763 = vmatprep.mubr.msk.f32.mxu0 %vm294_vm0, %v6706_v22 }
  0xde   : > { %5540 = vmatmul.mubr.msk.f32.gmra.mrb[4].mxu1 %vm294_vm0, %v7313_v1  ;;  %v6959_v1 = vld [vmem:[%s6198_s27 + $0x189] sm:$0xff] }
  0xdf   : > { %5764 = vmatmul.mubr.msk.f32.gmra.mrb[20].mxu0 %vm294_vm0, %v6717_v24  ;;  %5542 = vmatprep.mubr.msk.f32.mxu1 %vm294_vm0, %v7314_v35  ;;  %v4980_v35 = vld [vmem:[%s6198_s27 + $0x199] sm:$0xff] }
  0xe0   : > { %5766 = vmatprep.mubr.msk.f32.mxu0 %vm294_vm0, %v6720_v26 }
  0xe2   : > { %5543 = vmatmul.mubr.msk.f32.gmra.mrb[6].mxu1 %vm294_vm0, %v7315_v16  ;;  %v7322_v16 = vld [vmem:[#allocation15_spill] sm:$0xff] }
  0xe3   : > { %5767 = vmatmul.mubr.msk.f32.gmra.mrb[22].mxu0 %vm294_vm0, %v6731_v28  ;;  %5545 = vmatprep.mubr.msk.f32.mxu1 %vm294_vm0, %v7316_v37  ;;  %v4981_v37 = vld [vmem:[%s6198_s27 + $0x1a1] sm:$0xff] }
  0xe4   : > { %5769 = vmatprep.mubr.msk.f32.mxu0 %vm294_vm0, %v7317_v10 }
  0xe6   : > { %5546 = vmatmul.mubr.msk.f32.gmra.mrb[8].mxu1 %vm294_vm0, %v7318_v11  ;;  %v7323_v11 = vld [vmem:[#allocation16_spill] sm:$0xff] }
  0xe7   : > { %5770 = vmatmul.mubr.msk.f32.gmra.mrb[24].mxu0 %vm294_vm0, %v6745_v32  ;;  %5548 = vmatprep.mubr.msk.f32.mxu1 %vm294_vm0, %v7319_v27 }
  0xe8   : > { %5772 = vmatprep.mubr.msk.f32.mxu0 %vm294_vm0, %v6748_v34 }
  0xea   : > { %5549 = vmatmul.mubr.msk.f32.gmra.mrb[10].mxu1 %vm294_vm0, %v7320_v31 }
  0xeb   : > { %5773 = vmatmul.mubr.msk.f32.gmra.mrb[26].mxu0 %vm294_vm0, %v6759_v36  ;;  %5551 = vmatprep.mubr.msk.f32.mxu1 %vm294_vm0, %v7321_v33 }
  0xec   : > { %5775 = vmatprep.mubr.msk.f32.mxu0 %vm294_vm0, %v6948_v29 }
  0xee   : > { %5552 = vmatmul.mubr.msk.f32.gmra.mrb[12].mxu1 %vm294_vm0, %v7322_v16 }
  0xef   : > { %5776 = vmatmul.mubr.msk.f32.gmra.mrb[28].mxu0 %vm294_vm0, %v6959_v1  ;;  %5554 = vmatprep.mubr.msk.f32.mxu1 %vm294_vm0, %v6363_v38  ;;  %v7324_v38 = vld [vmem:[#allocation20_spill] sm:$0xff] }
  0xf0   : > { %5778 = vmatprep.mubr.msk.f32.mxu0 %vm294_vm0, %v4980_v35 }
  0xf2   : > { %5555 = vmatmul.mubr.msk.f32.gmra.mrb[14].mxu1 %vm294_vm0, %v7323_v11 }
  0xf3   : > { %5779 = vmatmul.mubr.msk.f32.gmra.mrb[30].mxu0 %vm294_vm0, %v4981_v37  ;;  %5557 = vmatprep.mubr.msk.f32.mxu1 %vm294_vm0, %v6383_v42  ;;  %v7325_v42 = vld [vmem:[#allocation22_spill] sm:$0xff] }
  0xf4   : > { %5783 = vmatprep.mubr.msk.f32.mxu0 %vm294_vm0, %v6386_v43  ;;  %v7326_v43 = vld [vmem:[#allocation24_spill] sm:$0xff] }
  0xf6   : > { %5558 = vmatmul.mubr.msk.f32.gmra.mrb[16].mxu1 %vm294_vm0, %v6401_v45  ;;  %v7327_v45 = vld [vmem:[#allocation37_spill] sm:$0xff] }
  0xf7   : > { %5784 = vmatmul.mubr.msk.f32.vlgmr.msra.gmra.mrb[0].mxu0 %vm294_vm0, %v6404_v46  ;;  %5560 = vmatprep.mubr.msk.f32.mxu1 %vm294_vm0, %v6409_v47 }
  0xf8   : > { %5786 = vmatprep.mubr.msk.f32.mxu0 %vm294_vm0, %v6412_v48 }
  0xfa   : > { %5561 = vmatmul.mubr.msk.f32.gmra.mrb[18].mxu1 %vm294_vm0, %v6424_v49 }
  0xfb   : > { %5787 = vmatmul.mubr.msk.f32.gmra.mrb[2].mxu0 %vm294_vm0, %v6427_v50  ;;  %5563 = vmatprep.mubr.msk.f32.mxu1 %vm294_vm0, %v6430_v51 }
  0xfc   : > { %5789 = vmatprep.mubr.msk.f32.mxu0 %vm294_vm0, %v6433_v52 }
  0xfe   : > { %5564 = vmatmul.mubr.msk.f32.gmra.mrb[20].mxu1 %vm294_vm0, %v6444_v53 }
  0xff   : > { %5790 = vmatmul.mubr.msk.f32.gmra.mrb[4].mxu0 %vm294_vm0, %v6447_v54  ;;  %5566 = vmatprep.mubr.msk.f32.mxu1 %vm294_vm0, %v6450_v55 }
 0x100   : > { %5792 = vmatprep.mubr.msk.f32.mxu0 %vm294_vm0, %v6453_v56  ;;  %v7118_v56 = vld [vmem:[%s7208_s2] ss:$0 sm:$0xff] }
 0x102   : > { %5567 = vmatmul.mubr.msk.f32.gmra.mrb[22].mxu1 %vm294_vm0, %v6464_v57 }
 0x103   : > { %5793 = vmatmul.mubr.msk.f32.gmra.mrb[6].mxu0 %vm294_vm0, %v6467_v58  ;;  %5569 = vmatprep.mubr.msk.f32.mxu1 %vm294_vm0, %v6470_v59 }
 0x104   : > { %5795 = vmatprep.mubr.msk.f32.mxu0 %vm294_vm0, %v7295_v39 }
 0x106   : > { %5570 = vmatmul.mubr.msk.f32.gmra.mrb[24].mxu1 %vm294_vm0, %v6484_v61 }
 0x107   : > { %5796 = vmatmul.mubr.msk.f32.gmra.mrb[8].mxu0 %vm294_vm0, %v7296_v60  ;;  %5572 = vmatprep.mubr.msk.f32.mxu1 %vm294_vm0, %v6490_v63 }
 0x108   : > { %5798 = vmatprep.mubr.msk.f32.mxu0 %vm294_vm0, %v7297_v4 }
 0x10a   : > { %5573 = vmatmul.mubr.msk.f32.gmra.mrb[26].mxu1 %vm294_vm0, %v7324_v38 }
 0x10b   : > { %5799 = vmatmul.mubr.msk.f32.gmra.mrb[10].mxu0 %vm294_vm0, %v7298_v2  ;;  %5575 = vmatprep.mubr.msk.f32.mxu1 %vm294_vm0, %v7325_v42 }
 0x10c   : > { %5801 = vmatprep.mubr.msk.f32.mxu0 %vm294_vm0, %v7299_v30 }
 0x10e   : > { %5576 = vmatmul.mubr.msk.f32.gmra.mrb[28].mxu1 %vm294_vm0, %v7326_v43 }
 0x10f   : > { %5802 = vmatmul.mubr.msk.f32.gmra.mrb[12].mxu0 %vm294_vm0, %v6527_v12  ;;  %5578 = vmatprep.mubr.msk.f32.mxu1 %vm294_vm0, %v7327_v45  ;;  %v7328_v12 = vld [vmem:[#allocation34_spill] sm:$0xff] }
 0x110   : > { %5804 = vmatprep.mubr.msk.f32.mxu0 %vm294_vm0, %v7300_v41 }
 0x112   : > { %5579 = vmatmul.mubr.msk.f32.gmra.mrb[30].mxu1 %vm294_vm0, %v6823_v40 }
 0x113   : > { %5805 = vmatmul.mubr.msk.f32.gmra.mrb[14].mxu0 %vm294_vm0, %v6542_v3  ;;  %5607 = vmatprep.mubr.msk.f32.mxu1 %vm294_vm0, %v6657_v5 }
 0x114   : > { %5807 = vmatprep.mubr.msk.f32.mxu0 %vm294_vm0, %v6545_v62 }
 0x116   : > { %5608 = vmatmul.mubr.msk.f32.vlgmr.msra.gmra.mrb[16].mxu1 %vm294_vm0, %v6672_v7 }
 0x117   : > { %5808 = vmatmul.mubr.msk.f32.gmra.mrb[16].mxu0 %vm294_vm0, %v6559_v8  ;;  %5610 = vmatprep.mubr.msk.f32.mxu1 %vm294_vm0, %v6677_v14  ;;  %v5045_v14 = vld [vmem:[%s6198_s27 + $0x19a] sm:$0xff] }
 0x118   : > { %5810 = vmatprep.mubr.msk.f32.mxu0 %vm294_vm0, %v6564_v0 }
 0x11a   : > { %5611 = vmatmul.mubr.msk.f32.gmra.mrb[18].mxu1 %vm294_vm0, %v6689_v44 }
 0x11b   : > { %5811 = vmatmul.mubr.msk.f32.gmra.mrb[18].mxu0 %vm294_vm0, %v7301_v9  ;;  %5613 = vmatprep.mubr.msk.f32.mxu1 %vm294_vm0, %v6692_v18  ;;  %v7329_v18 = vld [vmem:[#allocation35_spill] sm:$0xff] }
 0x11c   : > { %5813 = vmatprep.mubr.msk.f32.mxu0 %vm294_vm0, %v7302_v13 }
 0x11e   : > { %5614 = vmatmul.mubr.msk.f32.gmra.mrb[20].mxu1 %vm294_vm0, %v6703_v20  ;;  %v5046_v20 = vld [vmem:[%s6198_s27 + $0x1a2] sm:$0xff] }
 0x11f   : > { %5814 = vmatmul.mubr.msk.f32.gmra.mrb[20].mxu0 %vm294_vm0, %v7303_v15  ;;  %5616 = vmatprep.mubr.msk.f32.mxu1 %vm294_vm0, %v6706_v22 }
 0x120   : > { %5816 = vmatprep.mubr.msk.f32.mxu0 %vm294_vm0, %v7304_v17 }
 0x122   : > { %5617 = vmatmul.mubr.msk.f32.gmra.mrb[22].mxu1 %vm294_vm0, %v6717_v24 }
 0x123   : > { %5817 = vmatmul.mubr.msk.f32.gmra.mrb[22].mxu0 %vm294_vm0, %v7305_v19  ;;  %5619 = vmatprep.mubr.msk.f32.mxu1 %vm294_vm0, %v6720_v26 }
 0x124   : > { %5819 = vmatprep.mubr.msk.f32.mxu0 %vm294_vm0, %v7306_v21 }
 0x126   : > { %5620 = vmatmul.mubr.msk.f32.gmra.mrb[24].mxu1 %vm294_vm0, %v6731_v28 }
 0x127   : > { %5820 = vmatmul.mubr.msk.f32.gmra.mrb[24].mxu0 %vm294_vm0, %v7307_v23  ;;  %5622 = vmatprep.mubr.msk.f32.mxu1 %vm294_vm0, %v7317_v10 }
 0x128   : > { %5822 = vmatprep.mubr.msk.f32.mxu0 %vm294_vm0, %v6621_v6 }
 0x12a   : > { %5623 = vmatmul.mubr.msk.f32.gmra.mrb[26].mxu1 %vm294_vm0, %v6745_v32 }
 0x12b   : > { %5823 = vmatmul.mubr.msk.f32.gmra.mrb[26].mxu0 %vm294_vm0, %v7308_v25  ;;  %5625 = vmatprep.mubr.msk.f32.mxu1 %vm294_vm0, %v6748_v34 }
 0x12c   : > { %5825 = vmatprep.mubr.msk.f32.mxu0 %vm294_vm0, %v7328_v12 }
 0x12e   : > { %5626 = vmatmul.mubr.msk.f32.gmra.mrb[28].mxu1 %vm294_vm0, %v6759_v36 }
 0x12f   : > { %5826 = vmatmul.mubr.msk.f32.gmra.mrb[28].mxu0 %vm294_vm0, %v7329_v18  ;;  %5628 = vmatprep.mubr.msk.f32.mxu1 %vm294_vm0, %v6948_v29 }
 0x130   : > { %5828 = vmatprep.mubr.msk.f32.mxu0 %vm294_vm0, %v5045_v14 }
 0x132   : > { %5629 = vmatmul.mubr.msk.f32.gmra.mrb[30].mxu1 %vm294_vm0, %v6959_v1 }
 0x133   : > { %5829 = vmatmul.mubr.msk.f32.gmra.mrb[30].mxu0 %vm294_vm0, %v5046_v20 }
 0x1a9   : > { %v5535_v22 = vpop.f32.mrb[0].mxu1 }
 0x1aa   : > { %v1813_v24 = vpop.f32.mrb[1].mxu1 }
 0x1ad   : > { %v5538_v26 = vpop.f32.mrb[2].mxu1 }
 0x1ae   : > { %v1823_v28 = vpop.f32.mrb[3].mxu1 }
 0x1b1   : > { %v5541_v32 = vpop.f32.mrb[4].mxu1 }
 0x1b2   : > { %v1833_v34 = vpop.f32.mrb[5].mxu1 }
 0x1b5   : > { %v5544_v36 = vpop.f32.mrb[6].mxu1 }
 0x1b6   : > { %v1843_v46 = vpop.f32.mrb[7].mxu1 }
 0x1b9   : > { %v5547_v47 = vpop.f32.mrb[8].mxu1 }
 0x1ba   : > { %v7101_v48 = vpop.f32.mrb[9].mxu1 }
 0x1bd   : > { %v7103_v49 = vpop.f32.mrb[10].mxu1 }
 0x1be   : > { %v7105_v50 = vpop.f32.mrb[11].mxu1 }
 0x1c1   : > { %v7107_v51 = vpop.f32.mrb[12].mxu1 }
 0x1c2   : > { %v7109_v52 = vpop.f32.mrb[13].mxu1 }
 0x1c5   : > { %v7111_v53 = vpop.f32.mrb[14].mxu1 }
 0x1c6   : > { %v7113_v54 = vpop.f32.mrb[15].mxu1 }
 0x1ca   : > { %v5785_v55 = vpop.f32.mrb[0].mxu0 }
 0x1cb   : > { %v5833_v57 = vadd.f32 %v5785_v55, %v5535_v22  ;;  %v4071_v58 = vpop.f32.mrb[1].mxu0 }
 0x1cc   : > { %v5834_v59 = vadd.f32 %v4071_v58, %v1813_v24 }
 0x1cd   : > { %v4334_v61 = vadd.f32 %v5833_v57, %v7118_v56 }
 0x1ce   : > { %v4333_v62 = vadd.f32 %v5834_v59, %v7118_v56  ;;  %v5788_v63 = vpop.f32.mrb[2].mxu0 }
 0x1cf   : > { %vm4366_vm1 = vcmp.ge.f32.partialorder %v4334_v61, 0.0  ;;  %v4398_v0 = vmul.f32 0.01, %v4334_v61  ;;  %v5835_v2 = vadd.f32 %v5788_v63, %v5538_v26  ;;  %v4081_v3 = vpop.f32.mrb[3].mxu0 }
 0x1d0   : > { %vm4365_vm2 = vcmp.ge.f32.partialorder %v4333_v62, 0.0  ;;  %v4397_v4 = vmul.f32 0.01, %v4333_v62  ;;  %v5836_v8 = vadd.f32 %v4081_v3, %v1823_v28 }
 0x1d1   : > { %v4430_v5 = vsel %vm4366_vm1, %v4334_v61, %v4398_v0  ;;  %v4336_v7 = vadd.f32 %v5835_v2, %v7118_v56 }
 0x1d2   : > { %4462 = vst [vmem:[%s7126_s20 + $0x8] sm:$0xff] %v4430_v5  ;;  %v4429_v6 = vsel %vm4365_vm2, %v4333_v62, %v4397_v4  ;;  %v4335_v44 = vadd.f32 %v5836_v8, %v7118_v56  ;;  %v5791_v30 = vpop.f32.mrb[4].mxu0 }
 0x1d3   : > { %4461 = vst [vmem:[%s7126_s20] sm:$0xff] %v4429_v6  ;;  %vm4368_vm3 = vcmp.ge.f32.partialorder %v4336_v7, 0.0  ;;  %v4400_v39 = vmul.f32 0.01, %v4336_v7  ;;  %v5837_v40 = vadd.f32 %v5791_v30, %v5541_v32  ;;  %v4091_v60 = vpop.f32.mrb[5].mxu0 }
 0x1d4   : > { %vm4367_vm4 = vcmp.ge.f32.partialorder %v4335_v44, 0.0  ;;  %v4399_v41 = vmul.f32 0.01, %v4335_v44  ;;  %v5838_v9 = vadd.f32 %v4091_v60, %v1833_v34 }
 0x1d5   : > { %v4432_v13 = vsel %vm4368_vm3, %v4336_v7, %v4400_v39  ;;  %v4338_v15 = vadd.f32 %v5837_v40, %v7118_v56 }
 0x1d6   : > { %4464 = vst [vmem:[%s7126_s20 + $0x18] sm:$0xff] %v4432_v13  ;;  %v4431_v17 = vsel %vm4367_vm4, %v4335_v44, %v4399_v41  ;;  %v4337_v19 = vadd.f32 %v5838_v9, %v7118_v56  ;;  %v5794_v21 = vpop.f32.mrb[6].mxu0 }
 0x1d7   : > { %4463 = vst [vmem:[%s7126_s20 + $0x10] sm:$0xff] %v4431_v17  ;;  %vm4370_vm5 = vcmp.ge.f32.partialorder %v4338_v15, 0.0  ;;  %v4402_v23 = vmul.f32 0.01, %v4338_v15  ;;  %v5839_v25 = vadd.f32 %v5794_v21, %v5544_v36  ;;  %v4101_v10 = vpop.f32.mrb[7].mxu0 }
 0x1d8   : > { %vm4369_vm6 = vcmp.ge.f32.partialorder %v4337_v19, 0.0  ;;  %v4401_v27 = vmul.f32 0.01, %v4337_v19  ;;  %v5840_v29 = vadd.f32 %v4101_v10, %v1843_v46 }
 0x1d9   : > { %v4434_v31 = vsel %vm4370_vm5, %v4338_v15, %v4402_v23  ;;  %v4340_v33 = vadd.f32 %v5839_v25, %v7118_v56 }
 0x1da   : > { %4466 = vst [vmem:[%s7126_s20 + $0x28] sm:$0xff] %v4434_v31  ;;  %v4433_v1 = vsel %vm4369_vm6, %v4337_v19, %v4401_v27  ;;  %v4339_v35 = vadd.f32 %v5840_v29, %v7118_v56  ;;  %v5797_v16 = vpop.f32.mrb[8].mxu0 }
 0x1db   : > { %4465 = vst [vmem:[%s7126_s20 + $0x20] sm:$0xff] %v4433_v1  ;;  %vm4372_vm7 = vcmp.ge.f32.partialorder %v4340_v33, 0.0  ;;  %v4404_v37 = vmul.f32 0.01, %v4340_v33  ;;  %v5841_v11 = vadd.f32 %v5797_v16, %v5547_v47  ;;  %v4111_v38 = vpop.f32.mrb[9].mxu0 }
 0x1dc   : > { %vm4371_vm8 = vcmp.ge.f32.partialorder %v4339_v35, 0.0  ;;  %v4403_v42 = vmul.f32 0.01, %v4339_v35  ;;  %v5842_v43 = vadd.f32 %v4111_v38, %v7101_v48 }
 0x1dd   : > { %v4436_v45 = vsel %vm4372_vm7, %v4340_v33, %v4404_v37  ;;  %v4342_v12 = vadd.f32 %v5841_v11, %v7118_v56 }
 0x1de   : > { %4468 = vst [vmem:[%s7126_s20 + $0x38] sm:$0xff] %v4436_v45  ;;  %v4435_v14 = vsel %vm4371_vm8, %v4339_v35, %v4403_v42  ;;  %v4341_v18 = vadd.f32 %v5842_v43, %v7118_v56  ;;  %v5800_v20 = vpop.f32.mrb[10].mxu0 }
 0x1df   : > { %4467 = vst [vmem:[%s7126_s20 + $0x30] sm:$0xff] %v4435_v14  ;;  %vm4374_vm9 = vcmp.ge.f32.partialorder %v4342_v12, 0.0  ;;  %v4406_v22 = vmul.f32 0.01, %v4342_v12  ;;  %v5843_v24 = vadd.f32 %v5800_v20, %v7103_v49  ;;  %v4121_v26 = vpop.f32.mrb[11].mxu0 }
 0x1e0   : > { %vm4373_vm10 = vcmp.ge.f32.partialorder %v4341_v18, 0.0  ;;  %v4405_v28 = vmul.f32 0.01, %v4341_v18  ;;  %v5844_v32 = vadd.f32 %v4121_v26, %v7105_v50 }
 0x1e1   : > { %v4438_v34 = vsel %vm4374_vm9, %v4342_v12, %v4406_v22  ;;  %v4344_v36 = vadd.f32 %v5843_v24, %v7118_v56 }
 0x1e2   : > { %4470 = vst [vmem:[%s7126_s20 + $0x48] sm:$0xff] %v4438_v34  ;;  %v4437_v46 = vsel %vm4373_vm10, %v4341_v18, %v4405_v28  ;;  %v4343_v47 = vadd.f32 %v5844_v32, %v7118_v56  ;;  %v5803_v48 = vpop.f32.mrb[12].mxu0 }
 0x1e3   : > { %4469 = vst [vmem:[%s7126_s20 + $0x40] sm:$0xff] %v4437_v46  ;;  %vm4376_vm11 = vcmp.ge.f32.partialorder %v4344_v36, 0.0  ;;  %v4408_v55 = vmul.f32 0.01, %v4344_v36  ;;  %v5845_v49 = vadd.f32 %v5803_v48, %v7107_v51  ;;  %v4131_v57 = vpop.f32.mrb[13].mxu0 }
 0x1e4   : > { %vm4375_vm12 = vcmp.ge.f32.partialorder %v4343_v47, 0.0  ;;  %v4407_v58 = vmul.f32 0.01, %v4343_v47  ;;  %v5846_v50 = vadd.f32 %v4131_v57, %v7109_v52 }
 0x1e5   : > { %v4440_v59 = vsel %vm4376_vm11, %v4344_v36, %v4408_v55  ;;  %v4346_v61 = vadd.f32 %v5845_v49, %v7118_v56 }
 0x1e6   : > { %4472 = vst [vmem:[%s7126_s20 + $0x58] sm:$0xff] %v4440_v59  ;;  %v4439_v62 = vsel %vm4375_vm12, %v4343_v47, %v4407_v58  ;;  %v4345_v63 = vadd.f32 %v5846_v50, %v7118_v56  ;;  %v5806_v0 = vpop.f32.mrb[14].mxu0 }
 0x1e7   : > { %4471 = vst [vmem:[%s7126_s20 + $0x50] sm:$0xff] %v4439_v62  ;;  %vm4378_vm13 = vcmp.ge.f32.partialorder %v4346_v61, 0.0  ;;  %v4410_v2 = vmul.f32 0.01, %v4346_v61  ;;  %v5847_v51 = vadd.f32 %v5806_v0, %v7111_v53  ;;  %v4141_v3 = vpop.f32.mrb[15].mxu0 }
 0x1e8   : > { %vm4377_vm14 = vcmp.ge.f32.partialorder %v4345_v63, 0.0  ;;  %v4409_v4 = vmul.f32 0.01, %v4345_v63  ;;  %v5848_v52 = vadd.f32 %v4141_v3, %v7113_v54 }
 0x1e9   : > { %v4442_v8 = vsel %vm4378_vm13, %v4346_v61, %v4410_v2  ;;  %v4348_v5 = vadd.f32 %v5847_v51, %v7118_v56  ;;  %v5609_v44 = vpop.f32.mrb[16].mxu1 }
 0x1ea   : > { %4474 = vst [vmem:[%s7126_s20 + $0x68] sm:$0xff] %v4442_v8  ;;  %v4441_v7 = vsel %vm4377_vm14, %v4345_v63, %v4409_v4  ;;  %v4347_v6 = vadd.f32 %v5848_v52, %v7118_v56  ;;  %v5809_v30 = vpop.f32.mrb[16].mxu0  ;;  %v2344_v40 = vpop.f32.mrb[17].mxu1 }
 0x1eb   : > { %4473 = vst [vmem:[%s7126_s20 + $0x60] sm:$0xff] %v4441_v7  ;;  %vm4380_vm15 = vcmp.ge.f32.partialorder %v4348_v5, 0.0  ;;  %v4412_v39 = vmul.f32 0.01, %v4348_v5  ;;  %v5849_v53 = vadd.f32 %v5809_v30, %v5609_v44  ;;  %v4151_v60 = vpop.f32.mrb[17].mxu0 }
 0x1ec   : > { %vm4379_vm0 = vcmp.ge.f32.partialorder %v4347_v6, 0.0  ;;  %v4411_v41 = vmul.f32 0.01, %v4347_v6  ;;  %v5850_v54 = vadd.f32 %v4151_v60, %v2344_v40 }
 0x1ed   : > { %v4444_v9 = vsel %vm4380_vm15, %v4348_v5, %v4412_v39  ;;  %v4350_v13 = vadd.f32 %v5849_v53, %v7118_v56  ;;  %v5612_v19 = vpop.f32.mrb[18].mxu1 }
 0x1ee   : > { %4476 = vst [vmem:[%s7126_s20 + $0x78] sm:$0xff] %v4444_v9  ;;  %v4443_v15 = vsel %vm4379_vm0, %v4347_v6, %v4411_v41  ;;  %v4349_v17 = vadd.f32 %v5850_v54, %v7118_v56  ;;  %v5812_v21 = vpop.f32.mrb[18].mxu0  ;;  %v2354_v10 = vpop.f32.mrb[19].mxu1 }
 0x1ef   : > { %4475 = vst [vmem:[%s7126_s20 + $0x70] sm:$0xff] %v4443_v15  ;;  %vm4382_vm1 = vcmp.ge.f32.partialorder %v4350_v13, 0.0  ;;  %v4414_v23 = vmul.f32 0.01, %v4350_v13  ;;  %v5851_v25 = vadd.f32 %v5812_v21, %v5612_v19  ;;  %v4161_v27 = vpop.f32.mrb[19].mxu0 }
 0x1f0   : > { %vm4381_vm2 = vcmp.ge.f32.partialorder %v4349_v17, 0.0  ;;  %v4413_v29 = vmul.f32 0.01, %v4349_v17  ;;  %v5852_v31 = vadd.f32 %v4161_v27, %v2354_v10 }
 0x1f1   : > { %v4446_v33 = vsel %vm4382_vm1, %v4350_v13, %v4414_v23  ;;  %v4352_v1 = vadd.f32 %v5851_v25, %v7118_v56  ;;  %v5615_v37 = vpop.f32.mrb[20].mxu1 }
 0x1f2   : > { %4478 = vst [vmem:[%s7126_s20 + $0x88] sm:$0xff] %v4446_v33  ;;  %v4445_v35 = vsel %vm4381_vm2, %v4349_v17, %v4413_v29  ;;  %v4351_v16 = vadd.f32 %v5852_v31, %v7118_v56  ;;  %v5815_v11 = vpop.f32.mrb[20].mxu0  ;;  %v2364_v43 = vpop.f32.mrb[21].mxu1 }
 0x1f3   : > { %4477 = vst [vmem:[%s7126_s20 + $0x80] sm:$0xff] %v4445_v35  ;;  %vm4384_vm3 = vcmp.ge.f32.partialorder %v4352_v1, 0.0  ;;  %v4416_v38 = vmul.f32 0.01, %v4352_v1  ;;  %v5853_v42 = vadd.f32 %v5815_v11, %v5615_v37  ;;  %v4171_v45 = vpop.f32.mrb[21].mxu0 }
 0x1f4   : > { %vm4383_vm4 = vcmp.ge.f32.partialorder %v4351_v16, 0.0  ;;  %v4415_v12 = vmul.f32 0.01, %v4351_v16  ;;  %v5854_v14 = vadd.f32 %v4171_v45, %v2364_v43 }
 0x1f5   : > { %v4448_v18 = vsel %vm4384_vm3, %v4352_v1, %v4416_v38  ;;  %v4354_v20 = vadd.f32 %v5853_v42, %v7118_v56  ;;  %v5618_v26 = vpop.f32.mrb[22].mxu1 }
 0x1f6   : > { %4480 = vst [vmem:[%s7126_s20 + $0x98] sm:$0xff] %v4448_v18  ;;  %v4447_v22 = vsel %vm4383_vm4, %v4351_v16, %v4415_v12  ;;  %v4353_v24 = vadd.f32 %v5854_v14, %v7118_v56  ;;  %v5818_v28 = vpop.f32.mrb[22].mxu0  ;;  %v2374_v36 = vpop.f32.mrb[23].mxu1 }
 0x1f7   : > { %4479 = vst [vmem:[%s7126_s20 + $0x90] sm:$0xff] %v4447_v22  ;;  %vm4386_vm5 = vcmp.ge.f32.partialorder %v4354_v20, 0.0  ;;  %v4418_v32 = vmul.f32 0.01, %v4354_v20  ;;  %v5855_v34 = vadd.f32 %v5818_v28, %v5618_v26  ;;  %v4181_v46 = vpop.f32.mrb[23].mxu0 }
 0x1f8   : > { %vm4385_vm6 = vcmp.ge.f32.partialorder %v4353_v24, 0.0  ;;  %v4417_v47 = vmul.f32 0.01, %v4353_v24  ;;  %v5856_v48 = vadd.f32 %v4181_v46, %v2374_v36 }
 0x1f9   : > { %v4450_v55 = vsel %vm4386_vm5, %v4354_v20, %v4418_v32  ;;  %v4356_v49 = vadd.f32 %v5855_v34, %v7118_v56  ;;  %v5621_v50 = vpop.f32.mrb[24].mxu1 }
 0x1fa   : > { %4482 = vst [vmem:[%s7126_s20 + $0xa8] sm:$0xff] %v4450_v55  ;;  %v4449_v57 = vsel %vm4385_vm6, %v4353_v24, %v4417_v47  ;;  %v4355_v58 = vadd.f32 %v5856_v48, %v7118_v56  ;;  %v5821_v59 = vpop.f32.mrb[24].mxu0  ;;  %v2384_v63 = vpop.f32.mrb[25].mxu1 }
 0x1fb   : > { %4481 = vst [vmem:[%s7126_s20 + $0xa0] sm:$0xff] %v4449_v57  ;;  %vm4388_vm7 = vcmp.ge.f32.partialorder %v4356_v49, 0.0  ;;  %v4420_v61 = vmul.f32 0.01, %v4356_v49  ;;  %v5857_v62 = vadd.f32 %v5821_v59, %v5621_v50  ;;  %v4191_v0 = vpop.f32.mrb[25].mxu0 }
 0x1fc   : > { %vm4387_vm8 = vcmp.ge.f32.partialorder %v4355_v58, 0.0  ;;  %v4419_v2 = vmul.f32 0.01, %v4355_v58  ;;  %v5858_v51 = vadd.f32 %v4191_v0, %v2384_v63 }
 0x1fd   : > { %v4452_v3 = vsel %vm4388_vm7, %v4356_v49, %v4420_v61  ;;  %v4358_v4 = vadd.f32 %v5857_v62, %v7118_v56  ;;  %v5624_v5 = vpop.f32.mrb[26].mxu1 }
 0x1fe   : > { %4484 = vst [vmem:[%s7126_s20 + $0xb8] sm:$0xff] %v4452_v3  ;;  %v4451_v52 = vsel %vm4387_vm8, %v4355_v58, %v4419_v2  ;;  %v4357_v8 = vadd.f32 %v5858_v51, %v7118_v56  ;;  %v5824_v7 = vpop.f32.mrb[26].mxu0  ;;  %v2394_v30 = vpop.f32.mrb[27].mxu1 }
 0x1ff   : > { %4483 = vst [vmem:[%s7126_s20 + $0xb0] sm:$0xff] %v4451_v52  ;;  %vm4390_vm9 = vcmp.ge.f32.partialorder %v4358_v4, 0.0  ;;  %v4422_v6 = vmul.f32 0.01, %v4358_v4  ;;  %v5859_v44 = vadd.f32 %v5824_v7, %v5624_v5  ;;  %v4201_v39 = vpop.f32.mrb[27].mxu0 }
 0x200   : > { %vm4389_vm10 = vcmp.ge.f32.partialorder %v4357_v8, 0.0  ;;  %v4421_v53 = vmul.f32 0.01, %v4357_v8  ;;  %v5860_v40 = vadd.f32 %v4201_v39, %v2394_v30 }
 0x201   : > { %v4454_v60 = vsel %vm4390_vm9, %v4358_v4, %v4422_v6  ;;  %v4360_v41 = vadd.f32 %v5859_v44, %v7118_v56  ;;  %v5627_v13 = vpop.f32.mrb[28].mxu1 }
 0x202   : > { %4486 = vst [vmem:[%s7126_s20 + $0xc8] sm:$0xff] %v4454_v60  ;;  %v4453_v54 = vsel %vm4389_vm10, %v4357_v8, %v4421_v53  ;;  %v4359_v9 = vadd.f32 %v5860_v40, %v7118_v56  ;;  %v5827_v15 = vpop.f32.mrb[28].mxu0  ;;  %v2404_v21 = vpop.f32.mrb[29].mxu1 }
 0x203   : > { %4485 = vst [vmem:[%s7126_s20 + $0xc0] sm:$0xff] %v4453_v54  ;;  %vm4392_vm11 = vcmp.ge.f32.partialorder %v4360_v41, 0.0  ;;  %v4424_v17 = vmul.f32 0.01, %v4360_v41  ;;  %v5861_v19 = vadd.f32 %v5827_v15, %v5627_v13  ;;  %v4211_v23 = vpop.f32.mrb[29].mxu0 }
 0x204   : > { %vm4391_vm12 = vcmp.ge.f32.partialorder %v4359_v9, 0.0  ;;  %v4423_v25 = vmul.f32 0.01, %v4359_v9  ;;  %v5862_v10 = vadd.f32 %v4211_v23, %v2404_v21 }
 0x205   : > { %v4456_v27 = vsel %vm4392_vm11, %v4360_v41, %v4424_v17  ;;  %v4362_v29 = vadd.f32 %v5861_v19, %v7118_v56  ;;  %v5630_v1 = vpop.f32.mrb[30].mxu1 }
 0x206   : > { %4488 = vst [vmem:[%s7126_s20 + $0xd8] sm:$0xff] %v4456_v27  ;;  %v4455_v31 = vsel %vm4391_vm12, %v4359_v9, %v4423_v25  ;;  %v4361_v33 = vadd.f32 %v5862_v10, %v7118_v56  ;;  %v5830_v35 = vpop.f32.mrb[30].mxu0  ;;  %v2414_v11 = vpop.f32.mrb[31].mxu1 }
 0x207   : > { %4487 = vst [vmem:[%s7126_s20 + $0xd0] sm:$0xff] %v4455_v31  ;;  %vm4394_vm13 = vcmp.ge.f32.partialorder %v4362_v29, 0.0  ;;  %v4426_v16 = vmul.f32 0.01, %v4362_v29  ;;  %v5863_v37 = vadd.f32 %v5830_v35, %v5630_v1  ;;  %v4221_v38 = vpop.f32.mrb[31].mxu0 }
 0x208   : > { %vm4393_vm14 = vcmp.ge.f32.partialorder %v4361_v33, 0.0  ;;  %v4425_v42 = vmul.f32 0.01, %v4361_v33  ;;  %v5864_v43 = vadd.f32 %v4221_v38, %v2414_v11 }
 0x209   : > { %v4458_v45 = vsel %vm4394_vm13, %v4362_v29, %v4426_v16  ;;  %v4364_v12 = vadd.f32 %v5863_v37, %v7118_v56 }
 0x20a   : > { %4490 = vst [vmem:[%s7126_s20 + $0xe8] sm:$0xff] %v4458_v45  ;;  %v4457_v14 = vsel %vm4393_vm14, %v4361_v33, %v4425_v42  ;;  %v4363_v18 = vadd.f32 %v5864_v43, %v7118_v56 }
 0x20b   : > { %4489 = vst [vmem:[%s7126_s20 + $0xe0] sm:$0xff] %v4457_v14  ;;  %vm4396_vm15 = vcmp.ge.f32.partialorder %v4364_v12, 0.0  ;;  %v4428_v20 = vmul.f32 0.01, %v4364_v12 }
 0x20c   : > { %vm4395_vm0 = vcmp.ge.f32.partialorder %v4363_v18, 0.0  ;;  %v4427_v22 = vmul.f32 0.01, %v4363_v18 }
 0x20d   : > { %v4460_v24 = vsel %vm4396_vm15, %v4364_v12, %v4428_v20 }
 0x20e   : > { %4492 = vst [vmem:[%s7126_s20 + $0xf8] sm:$0xff] %v4460_v24  ;;  %v4459_v26 = vsel %vm4395_vm0, %v4363_v18, %v4427_v22 }
 0x20f   : > { %4491 = vst [vmem:[%s7126_s20 + $0xf0] sm:$0xff] %v4459_v26 }
 0x210 PF: > { %s13_s14 = sadd.s32 1, %s6136_s14   ;;  %s7330_s12 = smov %s6132_s13 }
 0x211   : > { %p10_p5 = scmp.ge.s32.totalorder %s13_s14, 4   ;;  %s7331_s13 = smov %s7333_s15 }
 0x213   :  { %12 = sbr.rel (!%p10_p5) target bundleno = 2 (0x2), region = 73 }

</bundles_post_ra>
